<compile_context>
chip_gen: v7x
topology: tpu7x:2x2x1
jax: 0.10.0
libtpu: 0.0.40
codegen_flags: <defaults>
</compile_context>

<pallas_src>
import math
from functools import partial

import jax
import jax.numpy as jnp
from jax import lax
from jax.experimental import pallas as pl
from jax.experimental.pallas import tpu as pltpu


def _sgd_kernel(step_phi_ref, inv_bc2_ref, step_s_ref, consts_ref,   # SMEM
                init_phase_ref, target_ref, prop_ref,                # VMEM in
                phi_ref, s_out_ref, loss_ref,                        # outputs
                *, num_iters, lr_s, s0, beta1, beta2, eps2, inv_n):
    tgt = target_ref[...]
    prop = prop_ref[...]
    c_s = consts_ref[0]          # (4/n) * sum(|tgt|)
    c_l = consts_ref[1]          # (3/n) * sum(|tgt|^2)

    def adam_step(t, carry, compute_loss):
        phi, m, v, s, ms, vs = carry

        theta = phi + prop
        ri = jnp.sin(theta)                       # EUP

        # --- phi update (Adam) ---------------------------------------------
        # g_phi = (2/n) * s * tgt * sin(theta)
        g_phi = ((2.0 * inv_n) * s) * (tgt * ri)
        a_phi = step_phi_ref[t]                   # lr   / (1 - beta1^t)
        ib2 = inv_bc2_ref[t]                      # 1    / (1 - beta2^t)
        m = beta1 * m + (1.0 - beta1) * g_phi
        v = beta2 * v + (1.0 - beta2) * (g_phi * g_phi)
        phi = phi - (a_phi * m) * lax.rsqrt(v * ib2 + eps2)

        loss = None
        need_cos = (lr_s > 0) or compute_loss
        if need_cos:
            rr = jnp.cos(theta)                   # EUP (only when needed)
            dot_tr = jnp.sum(tgt * rr)            # XLU reduce -> scalar

        if compute_loss:
            # mean-MSE loss of the original module, evaluated at the
            # pre-update (phi, s) of this (last) iteration:
            #   loss = 3*s^2 - (2/n)*s*sum(tgt*cos) - (4/n)*s*sum(|tgt|)
            #          + (3/n)*sum(|tgt|^2)
            loss = 3.0 * s * s - (2.0 * inv_n) * s * dot_tr - c_s * s + c_l

        # --- s update (Adam), only when it is a trainable parameter ---------
        if lr_s > 0:
            g_s = 6.0 * s - (2.0 * inv_n) * dot_tr - c_s
            a_s = step_s_ref[t]                   # lr_s / (1 - beta1^t)
            ms = beta1 * ms + (1.0 - beta1) * g_s
            vs = beta2 * vs + (1.0 - beta2) * (g_s * g_s)
            s = s - (a_s * ms) * lax.rsqrt(vs * ib2 + eps2)

        return (phi, m, v, s, ms, vs), loss

    phi0 = init_phase_ref[...]
    zeros = jnp.zeros_like(phi0)
    carry0 = (phi0, zeros, zeros,
              jnp.float32(s0), jnp.float32(0.0), jnp.float32(0.0))

    # all but the last iteration (no loss computation in steady state)
    carry = lax.fori_loop(
        0, num_iters - 1,
        lambda t, c: adam_step(t, c, compute_loss=False)[0],
        carry0)
    # last iteration: also produce the loss (pre-update, matching torch order)
    carry, loss = adam_step(num_iters - 1, carry, compute_loss=True)
    phi, _, _, s, _, _ = carry

    phi_ref[...] = phi
    s_out_ref[0] = s
    loss_ref[0] = loss


def sgd_pallas(init_phase, target_amp, phaseh, phaseu, phasec, *,
               num_iters, lr=0.1, lr_s=0.003, s0=1.0):
    H, W = init_phase.shape[-2:]
    PH, PW = phaseh.shape[-2:]
    assert (PH, PW) == (2 * H, 2 * W), "phase masks must live on the padded grid"
    assert num_iters >= 1

    ip = init_phase.reshape(H, W).astype(jnp.float32)
    tgt = target_amp.reshape(H, W).astype(jnp.float32)

    # Iteration-invariant propagator phase, summed and center-cropped at trace
    # time (the crop window is exactly where the zero-padded field is nonzero).
    oh, ow = H // 2, W // 2
    prop_full = (phaseh + phaseu + phasec).reshape(PH, PW).astype(jnp.float32)
    prop_c = prop_full[oh:oh + H, ow:ow + W]

    beta1, beta2, eps = 0.9, 0.999, 1e-8
    n = float(H * W)
    inv_n = 1.0 / n

    # Per-iteration Adam schedule scalars, precomputed at trace time (SMEM).
    t = jnp.arange(1, num_iters + 1, dtype=jnp.float32)
    bc1 = 1.0 - jnp.float32(beta1) ** t
    bc2 = 1.0 - jnp.float32(beta2) ** t
    step_phi = (lr / bc1).astype(jnp.float32)
    inv_bc2 = (1.0 / bc2).astype(jnp.float32)
    step_s = (lr_s / bc1).astype(jnp.float32)

    # Target-only constants hoisted to trace time.
    ta = jnp.abs(tgt)
    consts = jnp.stack([(4.0 * inv_n) * jnp.sum(ta),
                        (3.0 * inv_n) * jnp.sum(ta * ta)]).astype(jnp.float32)

    kernel = partial(_sgd_kernel, num_iters=int(num_iters), lr_s=float(lr_s),
                     s0=float(s0), beta1=beta1, beta2=beta2,
                     eps2=float(eps) ** 2, inv_n=inv_n)

    smem = pl.BlockSpec(memory_space=pltpu.MemorySpace.SMEM)
    vmem = pl.BlockSpec(memory_space=pltpu.MemorySpace.VMEM)

    # Explicit VMEM budget: a handful of (H, W) f32 residents (3 inputs, phi
    # output, phi/m/v carries, a few temporaries) + headroom.  Keeps realistic
    # SLM resolutions from tripping the 16/32 MiB default scoped limit while
    # staying under v7x's 64 MiB physical VMEM.
    vmem_bytes = int(min(64 * 2**20, max(32 * 2**20, 20 * H * W * 4 + 2**21)))

    phi, s, loss = pl.pallas_call(
        kernel,
        out_shape=(jax.ShapeDtypeStruct((H, W), jnp.float32),
                   jax.ShapeDtypeStruct((1,), jnp.float32),
                   jax.ShapeDtypeStruct((1,), jnp.float32)),
        in_specs=[smem, smem, smem, smem,   # Adam schedules + target constants
                  vmem,                     # init phase
                  vmem,                     # target
                  vmem],                    # cropped propagator phase
        out_specs=(vmem, smem, smem),
        compiler_params=pltpu.CompilerParams(vmem_limit_bytes=vmem_bytes),
    )(step_phi, inv_bc2, step_s, consts, ip, tgt, prop_c)

    return phi.reshape(init_phase.shape), s[0], loss[0]


class SGD:
    """JAX/Pallas analogue of the PyTorch SGD module (Adam-based phase optimizer)."""

    def __init__(self, phaseh, phaseu, phasec, feature_size, wavelength,
                 prop_dist, num_iters, propagator=None,
                 lr=0.1, lr_s=0.003, s0=1.0):
        self.phaseh = phaseh
        self.phaseu = phaseu
        self.phasec = phasec
        self.feature_size = feature_size
        self.wavelength = wavelength
        self.prop_dist = prop_dist
        self.num_iters = num_iters
        self.lr = lr
        self.lr_s = lr_s
        self.init_scale = s0

    def __call__(self, target_amp, init_phase=None):
        final_phase, _, _ = sgd_pallas(
            init_phase, target_amp, self.phaseh, self.phaseu, self.phasec,
            num_iters=self.num_iters, lr=self.lr, lr_s=self.lr_s,
            s0=self.init_scale)
        return final_phase


if __name__ == "__main__":
    H, W = 16, 256            # small synthetic SLM resolution (NCHW: 1,1,H,W)
    num_iters = 5

    key = jax.random.PRNGKey(0)
    k1, k2, k3, k4, k5 = jax.random.split(key, 5)
    init_phase = jax.random.uniform(k1, (1, 1, H, W), jnp.float32,
                                    -math.pi, math.pi)
    target_amp = jnp.abs(jax.random.normal(k2, (1, 1, H, W), jnp.float32))
    phaseh = jax.random.uniform(k3, (1, 1, 2 * H, 2 * W), jnp.float32,
                                -math.pi, math.pi)
    phaseu = jax.random.uniform(k4, (1, 1, 2 * H, 2 * W), jnp.float32,
                                -math.pi, math.pi)
    phasec = jax.random.uniform(k5, (1, 1, 2 * H, 2 * W), jnp.float32,
                                -math.pi, math.pi)

    model = SGD(phaseh, phaseu, phasec,
                feature_size=(6.4e-6, 6.4e-6), wavelength=520e-9,
                prop_dist=0.1, num_iters=num_iters,
                lr=0.1, lr_s=0.003, s0=1.0)

    final_phase = model(target_amp, init_phase=init_phase)
    final_phase = jax.block_until_ready(final_phase)

    assert final_phase.shape == init_phase.shape
    assert bool(jnp.all(jnp.isfinite(final_phase)))
    print("KERNEL_OK")
</pallas_src>

<mosaic_0001>
module attributes {stable_mosaic.version = 11 : i64} {
  func.func @_sgd_kernel(%arg0: memref<5xf32, #tpu.memory_space<smem>>, %arg1: memref<5xf32, #tpu.memory_space<smem>>, %arg2: memref<5xf32, #tpu.memory_space<smem>>, %arg3: memref<2xf32, #tpu.memory_space<smem>>, %arg4: memref<16x256xf32, #tpu.memory_space<vmem>>, %arg5: memref<16x256xf32, #tpu.memory_space<vmem>>, %arg6: memref<16x256xf32, #tpu.memory_space<vmem>>, %arg7: memref<16x256xf32, #tpu.memory_space<vmem>>, %arg8: memref<1xf32, #tpu.memory_space<smem>>, %arg9: memref<1xf32, #tpu.memory_space<smem>>) attributes {dimension_semantics = [], scalar_prefetch = 0 : i64, scratch_operands = 0 : i64, tpu.core_type = #tpu.core_type<tc>} {
    %c0 = arith.constant 0 : index
    %c0_0 = arith.constant 0 : index
    %0 = vector.load %arg5[%c0, %c0_0] : memref<16x256xf32, #tpu.memory_space<vmem>>, vector<16x256xf32>
    %c0_1 = arith.constant 0 : index
    %c0_2 = arith.constant 0 : index
    %1 = vector.load %arg6[%c0_1, %c0_2] : memref<16x256xf32, #tpu.memory_space<vmem>>, vector<16x256xf32>
    %c0_3 = arith.constant 0 : index
    %2 = memref.load %arg3[%c0_3] : memref<2xf32, #tpu.memory_space<smem>>
    %c1 = arith.constant 1 : index
    %3 = memref.load %arg3[%c1] : memref<2xf32, #tpu.memory_space<smem>>
    %c0_4 = arith.constant 0 : index
    %c0_5 = arith.constant 0 : index
    %4 = vector.load %arg4[%c0_4, %c0_5] : memref<16x256xf32, #tpu.memory_space<vmem>>, vector<16x256xf32>
    %cst = arith.constant 0.000000e+00 : f32
    %5 = vector.broadcast %cst : f32 to vector<16x256xf32>
    %cst_6 = arith.constant 1.000000e+00 : f32
    %cst_7 = arith.constant 0.000000e+00 : f32
    %cst_8 = arith.constant 0.000000e+00 : f32
    %c0_i32 = arith.constant 0 : i32
    %c4_i32 = arith.constant 4 : i32
    %6 = arith.addi %c0_i32, %c4_i32 : i32
    %c1_i32 = arith.constant 1 : i32
    %7:6 = scf.for %arg10 = %c0_i32 to %6 step %c1_i32 iter_args(%arg11 = %4, %arg12 = %5, %arg13 = %5, %arg14 = %cst_6, %arg15 = %cst_7, %arg16 = %cst_8) -> (vector<16x256xf32>, vector<16x256xf32>, vector<16x256xf32>, f32, f32, f32)  : i32 {
      %71 = arith.addf %arg11, %1 : vector<16x256xf32>
      %72 = math.sin %71 : vector<16x256xf32>
      %cst_32 = arith.constant 4.8828125E-4 : f32
      %73 = arith.mulf %cst_32, %arg14 : f32
      %74 = arith.mulf %0, %72 : vector<16x256xf32>
      %75 = vector.broadcast %73 : f32 to vector<16x256xf32>
      %76 = arith.mulf %75, %74 : vector<16x256xf32>
      %77 = arith.index_cast %arg10 : i32 to index
      %78 = memref.load %arg0[%77] : memref<5xf32, #tpu.memory_space<smem>>
      %79 = arith.index_cast %arg10 : i32 to index
      %80 = memref.load %arg1[%79] : memref<5xf32, #tpu.memory_space<smem>>
      %cst_33 = arith.constant 0.899999976 : f32
      %81 = vector.broadcast %cst_33 : f32 to vector<16x256xf32>
      %82 = arith.mulf %81, %arg12 : vector<16x256xf32>
      %cst_34 = arith.constant 1.000000e-01 : f32
      %83 = vector.broadcast %cst_34 : f32 to vector<16x256xf32>
      %84 = arith.mulf %83, %76 : vector<16x256xf32>
      %85 = arith.addf %82, %84 : vector<16x256xf32>
      %cst_35 = arith.constant 9.990000e-01 : f32
      %86 = vector.broadcast %cst_35 : f32 to vector<16x256xf32>
      %87 = arith.mulf %86, %arg13 : vector<16x256xf32>
      %88 = arith.mulf %76, %76 : vector<16x256xf32>
      %cst_36 = arith.constant 1.000000e-03 : f32
      %89 = vector.broadcast %cst_36 : f32 to vector<16x256xf32>
      %90 = arith.mulf %89, %88 : vector<16x256xf32>
      %91 = arith.addf %87, %90 : vector<16x256xf32>
      %92 = vector.broadcast %78 : f32 to vector<16x256xf32>
      %93 = arith.mulf %92, %85 : vector<16x256xf32>
      %94 = vector.broadcast %80 : f32 to vector<16x256xf32>
      %95 = arith.mulf %91, %94 : vector<16x256xf32>
      %cst_37 = arith.constant 1.000000e-16 : f32
      %96 = vector.broadcast %cst_37 : f32 to vector<16x256xf32>
      %97 = arith.addf %95, %96 : vector<16x256xf32>
      %98 = math.rsqrt %97 : vector<16x256xf32>
      %99 = arith.mulf %93, %98 : vector<16x256xf32>
      %100 = arith.subf %arg11, %99 : vector<16x256xf32>
      %101 = math.cos %71 : vector<16x256xf32>
      %102 = arith.mulf %0, %101 : vector<16x256xf32>
      %103 = vector.shape_cast %102 : vector<16x256xf32> to vector<1x16x256xf32>
      %cst_38 = arith.constant dense<0.000000e+00> : vector<1xf32>
      %104 = vector.multi_reduction <add>, %103, %cst_38 [1, 2] : vector<1x16x256xf32> to vector<1xf32>
      %105 = vector.shape_cast %104 : vector<1xf32> to vector<1x1x1xf32>
      %106 = vector.extract %105[0, 0, 0] : f32 from vector<1x1x1xf32>
      %cst_39 = arith.constant 6.000000e+00 : f32
      %107 = arith.mulf %cst_39, %arg14 : f32
      %cst_40 = arith.constant 4.8828125E-4 : f32
      %108 = arith.mulf %cst_40, %106 : f32
      %109 = arith.subf %107, %108 : f32
      %110 = arith.subf %109, %2 : f32
      %111 = arith.index_cast %arg10 : i32 to index
      %112 = memref.load %arg2[%111] : memref<5xf32, #tpu.memory_space<smem>>
      %cst_41 = arith.constant 0.899999976 : f32
      %113 = arith.mulf %cst_41, %arg15 : f32
      %cst_42 = arith.constant 1.000000e-01 : f32
      %114 = arith.mulf %cst_42, %110 : f32
      %115 = arith.addf %113, %114 : f32
      %cst_43 = arith.constant 9.990000e-01 : f32
      %116 = arith.mulf %cst_43, %arg16 : f32
      %117 = arith.mulf %110, %110 : f32
      %cst_44 = arith.constant 1.000000e-03 : f32
      %118 = arith.mulf %cst_44, %117 : f32
      %119 = arith.addf %116, %118 : f32
      %120 = arith.mulf %112, %115 : f32
      %121 = arith.mulf %119, %80 : f32
      %cst_45 = arith.constant 1.000000e-16 : f32
      %122 = arith.addf %121, %cst_45 : f32
      %123 = math.rsqrt %122 : f32
      %124 = arith.mulf %120, %123 : f32
      %125 = arith.subf %arg14, %124 : f32
      scf.yield %100, %85, %91, %125, %115, %119 : vector<16x256xf32>, vector<16x256xf32>, vector<16x256xf32>, f32, f32, f32
    }
    %c4_i32_9 = arith.constant 4 : i32
    %8 = arith.addf %7#0, %1 : vector<16x256xf32>
    %9 = math.sin %8 : vector<16x256xf32>
    %cst_10 = arith.constant 4.8828125E-4 : f32
    %10 = arith.mulf %cst_10, %7#3 : f32
    %11 = arith.mulf %0, %9 : vector<16x256xf32>
    %12 = vector.broadcast %10 : f32 to vector<16x256xf32>
    %13 = arith.mulf %12, %11 : vector<16x256xf32>
    %c4 = arith.constant 4 : index
    %14 = memref.load %arg0[%c4] : memref<5xf32, #tpu.memory_space<smem>>
    %c4_11 = arith.constant 4 : index
    %15 = memref.load %arg1[%c4_11] : memref<5xf32, #tpu.memory_space<smem>>
    %cst_12 = arith.constant 0.899999976 : f32
    %16 = vector.broadcast %cst_12 : f32 to vector<16x256xf32>
    %17 = arith.mulf %16, %7#1 : vector<16x256xf32>
    %cst_13 = arith.constant 1.000000e-01 : f32
    %18 = vector.broadcast %cst_13 : f32 to vector<16x256xf32>
    %19 = arith.mulf %18, %13 : vector<16x256xf32>
    %20 = arith.addf %17, %19 : vector<16x256xf32>
    %cst_14 = arith.constant 9.990000e-01 : f32
    %21 = vector.broadcast %cst_14 : f32 to vector<16x256xf32>
    %22 = arith.mulf %21, %7#2 : vector<16x256xf32>
    %23 = arith.mulf %13, %13 : vector<16x256xf32>
    %cst_15 = arith.constant 1.000000e-03 : f32
    %24 = vector.broadcast %cst_15 : f32 to vector<16x256xf32>
    %25 = arith.mulf %24, %23 : vector<16x256xf32>
    %26 = arith.addf %22, %25 : vector<16x256xf32>
    %27 = vector.broadcast %14 : f32 to vector<16x256xf32>
    %28 = arith.mulf %27, %20 : vector<16x256xf32>
    %29 = vector.broadcast %15 : f32 to vector<16x256xf32>
    %30 = arith.mulf %26, %29 : vector<16x256xf32>
    %cst_16 = arith.constant 1.000000e-16 : f32
    %31 = vector.broadcast %cst_16 : f32 to vector<16x256xf32>
    %32 = arith.addf %30, %31 : vector<16x256xf32>
    %33 = math.rsqrt %32 : vector<16x256xf32>
    %34 = arith.mulf %28, %33 : vector<16x256xf32>
    %35 = arith.subf %7#0, %34 : vector<16x256xf32>
    %36 = math.cos %8 : vector<16x256xf32>
    %37 = arith.mulf %0, %36 : vector<16x256xf32>
    %38 = vector.shape_cast %37 : vector<16x256xf32> to vector<1x16x256xf32>
    %cst_17 = arith.constant dense<0.000000e+00> : vector<1xf32>
    %39 = vector.multi_reduction <add>, %38, %cst_17 [1, 2] : vector<1x16x256xf32> to vector<1xf32>
    %40 = vector.shape_cast %39 : vector<1xf32> to vector<1x1x1xf32>
    %41 = vector.extract %40[0, 0, 0] : f32 from vector<1x1x1xf32>
    %cst_18 = arith.constant 3.000000e+00 : f32
    %42 = arith.mulf %cst_18, %7#3 : f32
    %43 = arith.mulf %42, %7#3 : f32
    %cst_19 = arith.constant 4.8828125E-4 : f32
    %44 = arith.mulf %cst_19, %7#3 : f32
    %45 = arith.mulf %44, %41 : f32
    %46 = arith.subf %43, %45 : f32
    %47 = arith.mulf %2, %7#3 : f32
    %48 = arith.subf %46, %47 : f32
    %49 = arith.addf %48, %3 : f32
    %cst_20 = arith.constant 6.000000e+00 : f32
    %50 = arith.mulf %cst_20, %7#3 : f32
    %cst_21 = arith.constant 4.8828125E-4 : f32
    %51 = arith.mulf %cst_21, %41 : f32
    %52 = arith.subf %50, %51 : f32
    %53 = arith.subf %52, %2 : f32
    %c4_22 = arith.constant 4 : index
    %54 = memref.load %arg2[%c4_22] : memref<5xf32, #tpu.memory_space<smem>>
    %cst_23 = arith.constant 0.899999976 : f32
    %55 = arith.mulf %cst_23, %7#4 : f32
    %cst_24 = arith.constant 1.000000e-01 : f32
    %56 = arith.mulf %cst_24, %53 : f32
    %57 = arith.addf %55, %56 : f32
    %cst_25 = arith.constant 9.990000e-01 : f32
    %58 = arith.mulf %cst_25, %7#5 : f32
    %59 = arith.mulf %53, %53 : f32
    %cst_26 = arith.constant 1.000000e-03 : f32
    %60 = arith.mulf %cst_26, %59 : f32
    %61 = arith.addf %58, %60 : f32
    %62 = arith.mulf %54, %57 : f32
    %63 = arith.mulf %61, %15 : f32
    %cst_27 = arith.constant 1.000000e-16 : f32
    %64 = arith.addf %63, %cst_27 : f32
    %65 = math.rsqrt %64 : f32
    %66 = arith.mulf %62, %65 : f32
    %67 = arith.subf %7#3, %66 : f32
    %c0_28 = arith.constant 0 : index
    %c0_29 = arith.constant 0 : index
    %68 = vector.load %arg7[%c0_28, %c0_29] : memref<16x256xf32, #tpu.memory_space<vmem>>, vector<16x256xf32>
    tpu.vector_store %arg7[%c0_28, %c0_29], %35 {strides = array<i32>} : memref<16x256xf32, #tpu.memory_space<vmem>>, vector<16x256xf32>,
    %c0_30 = arith.constant 0 : index
    %69 = memref.load %arg8[%c0_30] : memref<1xf32, #tpu.memory_space<smem>>
    memref.store %67, %arg8[%c0_30] : memref<1xf32, #tpu.memory_space<smem>>
    %c0_31 = arith.constant 0 : index
    %70 = memref.load %arg9[%c0_31] : memref<1xf32, #tpu.memory_space<smem>>
    memref.store %49, %arg9[%c0_31] : memref<1xf32, #tpu.memory_space<smem>>
    return
  }
}

</mosaic_0001>

<bundles_post_ra>
// kernel: tpu_custom_call.1
= control target key start
LH: loop header
LB: loop body
LE: loop exit
PB: predicated region body
PF: predicated region fallthrough
CT: control target
= control target key end

     0   :  { %15 = vsyncpa [#allocation5], 0  ;;  %s3965_s0 = inlined_call_operand.hbm [shape: f32[5], index: 0, kind: input, shape index: {}]   ;;  %s3966_s1 = inlined_call_operand.vmem [shape: f32[5], index: 1, kind: input, shape index: {}]   ;;  %s3967_s2 = inlined_call_operand.vmem [shape: f32[5], index: 2, kind: input, shape index: {}]   ;;  %s3968_s3 = inlined_call_operand.vmem [shape: f32[2], index: 3, kind: input, shape index: {}]   ;;  %s3969_s4 = inlined_call_operand.hbm [shape: f32[16,256], index: 4, kind: input, shape index: {}]   ;;  %s3970_s5 = inlined_call_operand.hbm [shape: f32[16,256], index: 5, kind: input, shape index: {}]   ;;  %s3971_s6 = inlined_call_operand.hbm [shape: f32[16,256], index: 6, kind: input, shape index: {}]   ;;  %s3972_s7 = inlined_call_operand.hbm [shape: f32[16,256], index: 7, kind: output, shape index: {0}]   ;;  %s3973_s8 = inlined_call_operand.hbm [shape: f32[1], index: 8, kind: output, shape index: {1}]   ;;  %s3974_s9 = inlined_call_operand.hbm [shape: f32[1], index: 9, kind: output, shape index: {2}]  }
   0x1   :  { %16 = vsyncpa [#allocation7], 0 }
   0x2   :  { %17 = vsyncpa [#allocation10], 0 }
   0x3   :  { %18 = vsyncpa [#allocation3], 0 }
   0x4   :  { %19 = vsyncpa [#allocation14], 0 }
   0x5   :  { %20 = vsyncpa [#allocation4], 0 }
   0x6   :  { %21 = vsyncpa [#allocation6], 0  ;;  %s47_s11 = sshll.u32 %s3967_s2, 4  ;;  %s48_s11 = int_to_ptr.vmem [resolvable:$true] %s47_s11 }
   0x7   :  { %22 = vsyncpa [#allocation19], 0  ;;  %s2445_s12 = scalar_lea.vmem %s48_s11, 16  ;;  %p2450_p1 = scmp.lt.s32.totalorder %s48_s11, %s48_s11 }
   0x8   :  { %p2446_p0 = scmp.ne.s32.totalorder %s48_s11, %s2445_s12  ;;  %p2451_p2 = scmp.lt.s32.totalorder %s2445_s12, %s2445_s12 }
   0xa   :  { %p2452_p3 = por %p2451_p2, %p2450_p1 }
   0xc   :  { %p2453_p4 = pnand %p2452_p3, %p2446_p0 }
   0xe   :  { %2456 = shalt.err (!%p2453_p4)
}
   0xf   :  { %s2743_s13 = smov [#allocation9]   ;;  %s2744_s14 = smov [#allocation13]  }
  0x10   :  { %50 = dma.vmem_to_smem %s48_s11, 16, %s2743_s13, [#allocation10]  }
  0x11   :  { %s78_s15 = sshll.u32 %s2744_s14, 4  ;;  %s37_s18 = sshll.u32 %s3966_s1, 4  ;;  %s79_s15 = int_to_ptr.vmem [resolvable:$true] %s78_s15  ;;  %s38_s18 = int_to_ptr.vmem [resolvable:$true] %s37_s18 }
  0x12   :  { %s2457_s20 = scalar_lea.hbm %s3970_s5, 512 }
  0x13   :  { %p2458_p5 = scmp.ne.s32.totalorder %s3970_s5, %s2457_s20  ;;  %p2461_p6 = scmp.lt.u32.totalorder %s2457_s20, %s3970_s5 }
  0x15   :  { %p2463_p7 = pnand %p2461_p6, %p2458_p5 }
  0x17   :  { %2466 = shalt.err (!%p2463_p7)
}
  0x18   :  { %s2467_s25 = scalar_lea.vmem %s79_s15, 512  ;;  %p2472_p9 = scmp.lt.s32.totalorder %s79_s15, %s79_s15 }
  0x19   :  { %p2468_p8 = scmp.ne.s32.totalorder %s79_s15, %s2467_s25  ;;  %p2473_p10 = scmp.lt.s32.totalorder %s2467_s25, %s2467_s25 }
  0x1b   :  { %p2474_p11 = por %p2473_p10, %p2472_p9 }
  0x1d   :  { %p2475_p12 = pnand %p2474_p11, %p2468_p8 }
  0x1f   :  { %2478 = shalt.err (!%p2475_p12)
}
  0x20   :  { %s2745_s1 = smov 256   ;;  %s2746_s26 = smov 16  }
  0x21   :  { %84 = dma.hbm_to_vmem [thread:$0]  %s3970_s5, 512, %s79_s15, [#allocation14], %s2745_s1, %s2745_s1, %s2746_s26  }
  0x22   :  { %s2479_s10 = scalar_lea.hbm %s3965_s0, 16 }
  0x23   :  { %p2480_p13 = scmp.ne.s32.totalorder %s3965_s0, %s2479_s10  ;;  %p2483_p0 = scmp.lt.u32.totalorder %s2479_s10, %s3965_s0 }
  0x25   :  { %p2485_p1 = pnand %p2483_p0, %p2480_p13 }
  0x27   :  { %2488 = shalt.err (!%p2485_p1)
}
  0x28   :  { %s2747_s16 = smov [#allocation2]   ;;  %s2489_s5 = scalar_lea.vmem %s38_s18, 16 }
  0x29   :  { %30 = dma.hbm_to_smem %s3965_s0, 16, %s2747_s16, [#allocation5]  }
  0x2a   :  { %p2490_p2 = scmp.ne.s32.totalorder %s38_s18, %s2489_s5  ;;  %p2494_p3 = scmp.lt.s32.totalorder %s38_s18, %s38_s18 }
  0x2b   :  { %p2495_p4 = scmp.lt.s32.totalorder %s2489_s5, %s2489_s5 }
  0x2d   :  { %p2496_p5 = por %p2495_p4, %p2494_p3 }
  0x2f   :  { %p2497_p6 = pnand %p2496_p5, %p2490_p2 }
  0x31   :  { %2500 = shalt.err (!%p2497_p6)
}
  0x32   :  { %s2748_s15 = smov [#allocation8]   ;;  %s57_s21 = sshll.u32 %s3968_s3, 4  ;;  %s58_s21 = int_to_ptr.vmem [resolvable:$true] %s57_s21 }
  0x33   :  { %40 = dma.vmem_to_smem %s38_s18, 16, %s2748_s15, [#allocation7]  }
  0x34   :  { %s2501_s22 = scalar_lea.vmem %s58_s21, 16  ;;  %p2506_p8 = scmp.lt.s32.totalorder %s58_s21, %s58_s21 }
  0x35   :  { %p2502_p7 = scmp.ne.s32.totalorder %s58_s21, %s2501_s22  ;;  %p2507_p9 = scmp.lt.s32.totalorder %s2501_s22, %s2501_s22 }
  0x37   :  { %p2508_p10 = por %p2507_p9, %p2506_p8 }
  0x39   :  { %p2509_p11 = pnand %p2508_p10, %p2502_p7 }
  0x3b   :  { %2512 = shalt.err (!%p2509_p11)
}
  0x3c   :  { %s2749_s0 = smov [#allocation11]   ;;  %s2750_s23 = smov [#allocation12]  }
  0x3d   :  { %60 = dma.vmem_to_smem %s58_s21, 16, %s2749_s0, [#allocation10]  }
  0x3e   :  { %s66_s24 = sshll.u32 %s2750_s23, 4  ;;  %s2751_s25 = smov [#allocation15]   ;;  %s67_s24 = int_to_ptr.vmem [resolvable:$true] %s66_s24 }
  0x3f   :  { %s90_s27 = sshll.u32 %s2751_s25, 4  ;;  %s2513_s29 = scalar_lea.hbm %s3969_s4, 512  ;;  %s91_s27 = int_to_ptr.vmem [resolvable:$true] %s90_s27 }
  0x40   :  { %p2514_p12 = scmp.ne.s32.totalorder %s3969_s4, %s2513_s29  ;;  %p2517_p13 = scmp.lt.u32.totalorder %s2513_s29, %s3969_s4 }
  0x42   :  { %p2519_p0 = pnand %p2517_p13, %p2514_p12 }
  0x44   :  { %2522 = shalt.err (!%p2519_p0)
}
  0x45   :  { %s2523_s12 = scalar_lea.vmem %s67_s24, 512  ;;  %p2528_p2 = scmp.lt.s32.totalorder %s67_s24, %s67_s24 }
  0x46   :  { %p2524_p1 = scmp.ne.s32.totalorder %s67_s24, %s2523_s12  ;;  %p2529_p3 = scmp.lt.s32.totalorder %s2523_s12, %s2523_s12 }
  0x48   :  { %p2530_p4 = por %p2529_p3, %p2528_p2 }
  0x4a   :  { %p2531_p5 = pnand %p2530_p4, %p2524_p1 }
  0x4c   :  { %2534 = shalt.err (!%p2531_p5)
}
  0x4d   :  { %72 = dma.hbm_to_vmem [thread:$0]  %s3969_s4, 512, %s67_s24, [#allocation3], %s2745_s1, %s2745_s1, %s2746_s26  }
  0x4e   :  { %s2535_s19 = scalar_lea.hbm %s3971_s6, 512 }
  0x4f   :  { %p2536_p6 = scmp.ne.s32.totalorder %s3971_s6, %s2535_s19  ;;  %p2539_p7 = scmp.lt.u32.totalorder %s2535_s19, %s3971_s6 }
  0x51   :  { %p2541_p8 = pnand %p2539_p7, %p2536_p6 }
  0x53   :  { %2544 = shalt.err (!%p2541_p8)
}
  0x54   :  { %s2545_s21 = scalar_lea.vmem %s91_s27, 512  ;;  %p2550_p10 = scmp.lt.s32.totalorder %s91_s27, %s91_s27 }
  0x55   :  { %p2546_p9 = scmp.ne.s32.totalorder %s91_s27, %s2545_s21  ;;  %p2551_p11 = scmp.lt.s32.totalorder %s2545_s21, %s2545_s21 }
  0x57   :  { %p2552_p12 = por %p2551_p11, %p2550_p10 }
  0x59   :  { %p2553_p13 = pnand %p2552_p12, %p2546_p9 }
  0x5b   :  { %2556 = shalt.err (!%p2553_p13)
}
  0x5c   :  { %96 = dma.hbm_to_vmem [thread:$0]  %s3971_s6, 512, %s91_s27, [#allocation14], %s2745_s1, %s2745_s1, %s2746_s26  }
  0x5d   :  { %2663 = dma.done.wait [#allocation5], 16  }
  0x5e   :  { %2664 = vsyncadd [#allocation5], 4294967280 }
  0x5f   :  { %2665 = dma.done.wait [#allocation7], 16  }
  0x60   :  { %2666 = vsyncadd [#allocation7], 4294967280 }
  0x61   :  { %2667 = dma.done.wait [#allocation10], 32  }
  0x62   :  { %2668 = vsyncadd [#allocation10], 4294967264 }
  0x63   :  { %2669 = dma.done.wait [#allocation3], 512  }
  0x64   :  { %2670 = vsyncadd [#allocation3], 4294966784 }
  0x65   :  { %2671 = dma.done.wait [#allocation14], 1024  }
  0x66   :  { %2672 = vsyncadd [#allocation14], 4294966272 }
  0x67   :  { %118 = sfence }
  0x68   :  { %v2883_v0 = vld [vmem:[#allocation13] sm:$0xff]  ;;  %v2885_v1 = vld [vmem:[#allocation13 + $0x8] sm:$0xff]  ;;  %v2887_v2 = vld [vmem:[#allocation13 + $0x10] sm:$0xff]  ;;  %s2889_s0 = sld [smem:[#allocation11]]  ;;  %s2897_s6 = sld [smem:[#allocation11 + $0x1]]  ;;  %v2909_v12 = vmov 0.0  }
  0x69   :  { %v2891_v3 = vld [vmem:[#allocation13 + $0x18] sm:$0xff]  ;;  %v2893_v4 = vld [vmem:[#allocation15] sm:$0xff]  ;;  %v2895_v5 = vld [vmem:[#allocation15 + $0x8] sm:$0xff]  ;;  %s2903_s23 = smov 0.0   ;;  %s2905_s24 = smov 0.0   ;;  %v2911_v13 = vmov 0.0  }
  0x6a   :  { %v2899_v6 = vld [vmem:[#allocation15 + $0x10] sm:$0xff]  ;;  %v2901_v7 = vld [vmem:[#allocation15 + $0x18] sm:$0xff]  ;;  %v129_v8 = vld [vmem:[#allocation12] sm:$0xff]   ;;  %s2907_s25 = smov 1.0   ;;  %v2913_v14 = vmov 0.0   ;;  %v2915_v15 = vmov 0.0  }
  0x6b   :  { %v130_v9 = vld [vmem:[#allocation12 + $0x8] sm:$0xff]   ;;  %v131_v10 = vld [vmem:[#allocation12 + $0x10] sm:$0xff]   ;;  %v132_v11 = vld [vmem:[#allocation12 + $0x18] sm:$0xff]   ;;  %v2917_v16 = vmov 0.0   ;;  %v2919_v17 = vmov 0.0   ;;  %v2921_v18 = vmov 0.0  }
  0x6c   :  { %v2923_v19 = vmov 0.0   ;;  %s2933_s27 = smov 0  }
  0x6d LB: > { %v2985_v20 = vadd.f32 %v2737_v8, %v2893_v4  ;;  %v2989_v21 = vadd.f32 %v2733_v9, %v2895_v5  ;;  %v2995_v24 = vadd.f32 %v2729_v10, %v2899_v6  ;;  %v2752_v47 = vmov 683565275   ;;  %s574_s18 = smul.f32 0.00048828125, %s2689_s25  ;;  %s3297_s28 = sld [smem:[#allocation8 + %s2741_s27]]  ;;  %s2741_s27 = sphi %s2933_s27, %s138_s27   ;;  %v2737_v8 = vphi %v129_v8, %v4016_v8   ;;  %v2733_v9 = vphi %v130_v9, %v4015_v9   ;;  %v2729_v10 = vphi %v131_v10, %v4014_v10   ;;  %v2725_v11 = vphi %v132_v11, %v4013_v11   ;;  %v2721_v19 = vphi %v2923_v19, %v4012_v19   ;;  %v2717_v18 = vphi %v2921_v18, %v4011_v18   ;;  %v2713_v17 = vphi %v2919_v17, %v4010_v17   ;;  %v2709_v16 = vphi %v2917_v16, %v4009_v16   ;;  %v2705_v15 = vphi %v2915_v15, %v4008_v15   ;;  %v2701_v14 = vphi %v2913_v14, %v4007_v14   ;;  %v2697_v13 = vphi %v2911_v13, %v4006_v13   ;;  %v2693_v12 = vphi %v2909_v12, %v4005_v12   ;;  %s2689_s25 = sphi %s2907_s25, %s4004_s25   ;;  %s2685_s24 = sphi %s2905_s24, %s4003_s24   ;;  %s2681_s23 = sphi %s2903_s23, %s4001_s23  }
  0x6e   : > { %v2753_v49 = vmov 2475754826   ;;  %v2754_v51 = vmov 2131351028   ;;  %v3976_v53 = vmov 2102212464  }
  0x6f   : > { %v158_v22 = vand.u32 2147483647, %v2985_v20  ;;  %v161_v23 = vand.u32 2139095040, %v2985_v20  ;;  %v262_v25 = vand.u32 2147483647, %v2989_v21  ;;  %v265_v28 = vand.u32 2139095040, %v2989_v21 }
  0x70   : > { %v369_v32 = vand.u32 2139095040, %v2995_v24  ;;  %v3975_v42 = vand.u32 2147483647, %v2995_v24  ;;  %v2756_v55 = vmov 920167782   ;;  %vm160_vm13 = vcmp.lt.s32.totalorder %v2985_v20, 0 }
  0x71   : > { %v162_v26 = vshrl.u32 %v161_v23, 23  ;;  %v165_v27 = vand.u32 8388607, %v158_v22  ;;  %v269_v29 = vand.u32 8388607, %v262_v25  ;;  %v266_v31 = vshrl.u32 %v265_v28, 23 }
  0x72   : > { %v370_v37 = vshrl.u32 %v369_v32, 23  ;;  %v2757_v62 = vmov 1326507024   ;;  %vm3115_vm14 = vcmp.le.f32.partialorder %v158_v22, 0.7853982  ;;  %s584_s29 = sld [smem:[#allocation2 + %s2741_s27]] }
  0x73   : > { %v2134_v30 = vadd.s32 4294967169, %v162_v26  ;;  %v166_v34 = vor.u32 8388608, %v165_v27  ;;  %v2138_v35 = vadd.s32 4294967169, %v266_v31  ;;  %v270_v36 = vor.u32 8388608, %v269_v29  ;;  %s1068_s3 = smul.f32 6.0, %s2689_s25  ;;  %s1072_s12 = sld [smem:[#allocation9 + %s2741_s27]] }
  0x74   : > { %v3009_v45 = vadd.s32 4294967169, %v370_v37  ;;  %s1073_s14 = smul.f32 0.9, %s2685_s24  ;;  %s138_s27 = sadd.s32 1, %s2741_s27  }
  0x75   : > { %v168_v33 = vadd.s32 1, %v2134_v30  ;;  %v272_v39 = vadd.s32 1, %v2138_v35  ;;  %v3005_v43 = vshll.u32 %v166_v34, 8  ;;  %v3007_v44 = vshll.u32 %v270_v36, 8  ;;  %s1076_s16 = smul.f32 0.999, %s2681_s23 }
  0x76   : > { %p3477_p0 = scmp.ge.s32.totalorder %s138_s27, 4  }
  0x77   : > { %vm169_vm0 = vcmp.gt.s32.totalorder %v168_v33, 0  ;;  %vm273_vm1 = vcmp.gt.s32.totalorder %v272_v39, 0  ;;  %s2182_s27 = sld [smem:[#allocation2 + $0x4]] (%p3477_p0) }
  0x78   : > { %v170_v38 = vsel %vm169_vm0, %v168_v33, 0  ;;  %v274_v28 = vsel %vm273_vm1, %v272_v39, 0 }
  0x79   : > { %v171_v40 = vshrl.u32 %v170_v38, 5  ;;  %v172_v41 = vand.u32 31, %v170_v38  ;;  %v275_v31 = vshrl.u32 %v274_v28, 5  ;;  %v276_v32 = vand.u32 31, %v274_v28 }
  0x7b   : > { %v173_v46 = vsub.s32 32, %v172_v41  ;;  %v175_v48 = vshll.u32 %v2752_v47, %v172_v41  ;;  %v178_v50 = vshll.u32 %v2753_v49, %v172_v41  ;;  %v181_v52 = vshll.u32 %v2754_v51, %v172_v41 }
  0x7c   : > { %v184_v54 = vshll.u32 %v3976_v53, %v172_v41  ;;  %v187_v56 = vshll.u32 %v2756_v55, %v172_v41  ;;  %vm190_vm2 = vcmp.lt.s32.totalorder %v171_v40, 1  ;;  %vm191_vm3 = vcmp.lt.s32.totalorder %v171_v40, 2 }
  0x7d   : > { %v174_v57 = vshrl.u32 %v2752_v47, %v173_v46  ;;  %v176_v58 = vshrl.u32 %v2753_v49, %v173_v46  ;;  %v179_v59 = vshrl.u32 %v2754_v51, %v173_v46  ;;  %v182_v60 = vshrl.u32 %v3976_v53, %v173_v46 }
  0x7e   : > { %v185_v61 = vshrl.u32 %v2756_v55, %v173_v46  ;;  %v188_v63 = vshrl.u32 %v2757_v62, %v173_v46  ;;  %vm192_vm4 = vcmp.lt.s32.totalorder %v171_v40, 3  ;;  %vm193_vm5 = vcmp.lt.s32.totalorder %v171_v40, 4 }
  0x7f   : > { %v177_v23 = vor.u32 %v176_v58, %v175_v48  ;;  %v180_v26 = vor.u32 %v179_v59, %v178_v50  ;;  %v183_v27 = vor.u32 %v182_v60, %v181_v52  ;;  %v277_v46 = vsub.s32 32, %v276_v32 }
  0x80   : > { %v186_v29 = vor.u32 %v185_v61, %v184_v54  ;;  %v189_v30 = vor.u32 %v188_v63, %v187_v56  ;;  %v279_v52 = vshll.u32 %v2752_v47, %v276_v32  ;;  %vm294_vm6 = vcmp.lt.s32.totalorder %v275_v31, 1 }
  0x81   : > { %v194_v33 = vsel %vm190_vm2, %v174_v57, %v177_v23  ;;  %v195_v34 = vsel %vm193_vm5, %v183_v27, 2102212464  ;;  %v198_v35 = vsel %vm190_vm2, %v177_v23, %v180_v26  ;;  %v202_v36 = vsel %vm190_vm2, %v180_v26, %v183_v27 }
  0x82   : > { %v196_v37 = vsel %vm192_vm4, %v180_v26, %v195_v34  ;;  %v199_v38 = vsel %vm193_vm5, %v186_v29, 920167782  ;;  %v203_v41 = vsel %vm193_vm5, %v189_v30, 1326507024  ;;  %v278_v58 = vshrl.u32 %v2752_v47, %v277_v46 }
  0x83   : > { %v197_v48 = vsel %vm191_vm3, %v194_v33, %v196_v37  ;;  %v200_v39 = vsel %vm192_vm4, %v183_v27, %v199_v38  ;;  %v204_v50 = vsel %vm192_vm4, %v186_v29, %v203_v41  ;;  %v280_v23 = vshrl.u32 %v2753_v49, %v277_v46 }
  0x84   : > { %v201_v54 = vsel %vm191_vm3, %v198_v35, %v200_v39  ;;  %v205_v56 = vsel %vm191_vm3, %v202_v36, %v204_v50  ;;  %v213_v57 = vmul.u32 %v3005_v43, %v197_v48  ;;  %v282_v26 = vshll.u32 %v2753_v49, %v276_v32 }
  0x85   : > { %v3036_v59 = vmul.u32.u64.low %v3005_v43, %v205_v56  ;;  %v3037_v60 = vmul.u32.u64.high %v3005_v43, %v205_v56, %v3036_v59  ;;  %v3040_v61 = vmul.u32.u64.low %v3005_v43, %v201_v54  ;;  %v3041_v63 = vmul.u32.u64.high %v3005_v43, %v201_v54, %v3040_v61 }
  0x86   : > { %v283_v40 = vshrl.u32 %v2754_v51, %v277_v46  ;;  %v285_v27 = vshll.u32 %v2754_v51, %v276_v32  ;;  %v286_v28 = vshrl.u32 %v3976_v53, %v277_v46  ;;  %v288_v29 = vshll.u32 %v3976_v53, %v276_v32 }
  0x87   : > { %v289_v30 = vshrl.u32 %v2756_v55, %v277_v46  ;;  %v291_v33 = vshll.u32 %v2756_v55, %v276_v32  ;;  %v281_v34 = vor.u32 %v280_v23, %v279_v52  ;;  %v292_v35 = vshrl.u32 %v2757_v62, %v277_v46 }
  0x88   : > { %v284_v43 = vor.u32 %v283_v40, %v282_v26  ;;  %vm215_vm7 = vc.u32 %v3037_v60, %v3040_v61  ;;  %v216_v36 = vadd.s32 1, %v3041_v63  ;;  %v287_v37 = vor.u32 %v286_v28, %v285_v27 }
  0x89   : > { %v376_v38 = vadd.s32 1, %v3009_v45  ;;  %v290_v41 = vor.u32 %v289_v30, %v288_v29  ;;  %v293_v48 = vor.u32 %v292_v35, %v291_v33  ;;  %vm295_vm8 = vcmp.lt.s32.totalorder %v275_v31, 2 }
  0x8a   : > { %vm296_vm9 = vcmp.lt.s32.totalorder %v275_v31, 3  ;;  %v217_v39 = vsel %vm215_vm7, %v216_v36, %v3041_v63  ;;  %vm297_vm10 = vcmp.lt.s32.totalorder %v275_v31, 4  ;;  %v298_v32 = vsel %vm294_vm6, %v278_v58, %v281_v34 }
  0x8b   : > { %v302_v46 = vsel %vm294_vm6, %v281_v34, %v284_v43  ;;  %v218_v50 = vadd.s32 %v217_v39, %v213_v57  ;;  %v299_v52 = vsel %vm297_vm10, %v287_v37, 2102212464  ;;  %v303_v54 = vsel %vm297_vm10, %v290_v41, 920167782 }
  0x8c   : > { %v306_v56 = vsel %vm294_vm6, %v284_v43, %v287_v37  ;;  %v300_v59 = vsel %vm296_vm9, %v284_v43, %v299_v52  ;;  %v304_v45 = vsel %vm296_vm9, %v287_v37, %v303_v54  ;;  %v307_v23 = vsel %vm297_vm10, %v293_v48, 1326507024 }
  0x8d   : > { %vm377_vm11 = vcmp.gt.s32.totalorder %v376_v38, 0  ;;  %v3065_v26 = vadd.f32 %v2725_v11, %v2901_v7  ;;  %v219_v63 = vadd.s32 536870912, %v218_v50  ;;  %v305_v58 = vsel %vm295_vm8, %v302_v46, %v304_v45 }
  0x8e   : > { %v308_v40 = vsel %vm296_vm9, %v290_v41, %v307_v23  ;;  %v301_v57 = vsel %vm295_vm8, %v298_v32, %v300_v59  ;;  %v3072_v28 = vmul.u32.u64.low %v3007_v44, %v305_v58  ;;  %v3073_v29 = vmul.u32.u64.high %v3007_v44, %v305_v58, %v3072_v28 }
  0x8f   : > { %v309_v27 = vsel %vm295_vm8, %v306_v56, %v308_v40  ;;  %v220_v30 = vshrl.u32 %v219_v63, 30  ;;  %v378_v43 = vsel %vm377_vm11, %v376_v38, 0  ;;  %v373_v35 = vand.u32 8388607, %v3975_v42 }
  0x90   : > { %v3077_v33 = vmul.u32.u64.low %v3007_v44, %v309_v27  ;;  %v3078_v34 = vmul.u32.u64.high %v3007_v44, %v309_v27, %v3077_v33  ;;  %v380_v36 = vand.u32 31, %v378_v43  ;;  %v317_v41 = vmul.u32 %v3007_v44, %v301_v57 }
  0x91   : > { %v221_v37 = vshll.u32 %v220_v30, 30  ;;  %v473_v31 = vand.u32 2139095040, %v3065_v26  ;;  %v320_v48 = vadd.s32 1, %v3073_v29  ;;  %v374_v46 = vor.u32 8388608, %v373_v35 }
  0x92   : > { %vm319_vm12 = vc.u32 %v3078_v34, %v3072_v28  ;;  %v381_v32 = vsub.s32 32, %v380_v36  ;;  %v3092_v56 = vshrl.u32 %v378_v43, 5  ;;  %v244_v59 = vsub.s32 4, %v220_v30 }
  0x93   : > { %v3085_v39 = vsub.s32 %v218_v50, %v221_v37  ;;  %v321_v38 = vsel %vm319_vm12, %v320_v48, %v3073_v29  ;;  %v474_v44 = vshrl.u32 %v473_v31, 23  ;;  %v383_v45 = vshll.u32 %v2752_v47, %v380_v36 }
  0x94   : > { %v322_v54 = vadd.s32 %v321_v38, %v317_v41  ;;  %v386_v50 = vshll.u32 %v2753_v49, %v380_v36  ;;  %v392_v23 = vshll.u32 %v3976_v53, %v380_v36  ;;  %v384_v40 = vshrl.u32 %v2753_v49, %v381_v32 }
  0x95   : > { %v224_v52 = vsub.s32 0, %v3085_v39  ;;  %v387_v57 = vshrl.u32 %v2754_v51, %v381_v32  ;;  %v389_v27 = vshll.u32 %v2754_v51, %v380_v36  ;;  %v390_v29 = vshrl.u32 %v3976_v53, %v381_v32 }
  0x96   : > { %v323_v58 = vadd.s32 536870912, %v322_v54  ;;  %v393_v33 = vshrl.u32 %v2756_v55, %v381_v32  ;;  %v3103_v43 = vshll.u32 %v374_v46, 8  ;;  %v214_v35 = vadd.s32 %v3040_v61, %v3037_v60 }
  0x97   : > { %v2135_v63 = vmin.u32 %v224_v52, %v3085_v39  ;;  %v395_v41 = vshll.u32 %v2756_v55, %v380_v36  ;;  %v396_v31 = vshrl.u32 %v2757_v62, %v381_v32  ;;  %v245_v48 = vsel %vm160_vm13, %v244_v59, %v220_v30 }
  0x98   : > { %v3111_v38 = vshrl.u32 %v323_v58, 30  ;;  %v394_v52 = vor.u32 %v393_v33, %v392_v23  ;;  %v2146_v42 = vadd.s32 4294967169, %v474_v44  ;;  %v385_v60 = vor.u32 %v384_v40, %v383_v45 }
  0x99   : > { %v226_v37 = vclz %v2135_v63  ;;  %v388_v61 = vor.u32 %v387_v57, %v386_v50  ;;  %vm401_vm15 = vcmp.lt.s32.totalorder %v3092_v56, 4  ;;  %v382_v63 = vshrl.u32 %v2752_v47, %v381_v32 }
  0x9a   : > { %v325_v36 = vshll.u32 %v3111_v38, 30  ;;  %v391_v30 = vor.u32 %v390_v29, %v389_v27  ;;  %vm398_vm0 = vcmp.lt.s32.totalorder %v3092_v56, 1  ;;  %v397_v44 = vor.u32 %v396_v31, %v395_v41 }
  0x9b   : > { %v2136_v53 = vadd.s32 4294967294, %v226_v37  ;;  %vm400_vm2 = vcmp.lt.s32.totalorder %v3092_v56, 3  ;;  %v407_v22 = vsel %vm401_vm15, %v394_v52, 920167782  ;;  %vm399_vm3 = vcmp.lt.s32.totalorder %v3092_v56, 2 }
  0x9c   : > { %v3126_v23 = vsub.s32 %v322_v54, %v325_v36  ;;  %v403_v45 = vsel %vm401_vm15, %v391_v30, 2102212464  ;;  %v406_v40 = vsel %vm398_vm0, %v385_v60, %v388_v61  ;;  %v402_v27 = vsel %vm398_vm0, %v382_v63, %v385_v60 }
  0x9d   : > { %vm2137_vm1 = vcmp.lt.s32.totalorder %v2136_v53, 0  ;;  %v410_v54 = vsel %vm398_vm0, %v388_v61, %v391_v30  ;;  %v411_v37 = vsel %vm401_vm15, %v397_v44, 1326507024  ;;  %vm264_vm4 = vcmp.lt.s32.totalorder %v2989_v21, 0 }
  0x9e   : > { %v229_v59 = vsel %vm2137_vm1, 0, %v2136_v53  ;;  %v328_v57 = vsub.s32 0, %v3126_v23  ;;  %v408_v53 = vsel %vm400_vm2, %v391_v30, %v407_v22  ;;  %v412_v60 = vsel %vm400_vm2, %v394_v52, %v411_v37 }
  0x9f   : > { %v230_v50 = vsub.s32 32, %v229_v59  ;;  %v231_v32 = vshll.u32 %v3085_v39, %v229_v59  ;;  %v234_v58 = vsub.s32 4294967266, %v229_v59  ;;  %v404_v39 = vsel %vm400_vm2, %v388_v61, %v403_v45 }
  0xa0   : > { %v2139_v41 = vmin.u32 %v328_v57, %v3126_v23  ;;  %v409_v31 = vsel %vm399_vm3, %v406_v40, %v408_v53  ;;  %v480_v30 = vadd.s32 1, %v2146_v42  ;;  %v3155_v61 = vsel %vm3115_vm14, 0, %v245_v48 }
  0xa1   : > { %v232_v29 = vshrl.u32 %v214_v35, %v230_v50  ;;  %v235_v33 = vadd.s32 127, %v234_v58  ;;  %v413_v35 = vsel %vm399_vm3, %v410_v54, %v412_v60  ;;  %v405_v22 = vsel %vm399_vm3, %v402_v27, %v404_v39 }
  0xa2   : > { %v330_v44 = vclz %v2139_v41  ;;  %v470_v59 = vand.u32 2147483647, %v3065_v26  ;;  %v3165_v40 = vmul.u32.u64.low %v3103_v43, %v409_v31  ;;  %v3166_v42 = vmul.u32.u64.high %v3103_v43, %v409_v31, %v3165_v40 }
  0xa3   : > { %v233_v36 = vor.u32 %v232_v29, %v231_v32  ;;  %v236_v63 = vshll.u32 %v235_v33, 23  ;;  %v3161_v52 = vmul.u32.u64.low %v3103_v43, %v413_v35  ;;  %v3162_v32 = vmul.u32.u64.high %v3103_v43, %v413_v35, %v3161_v52 }
  0xa4   : > { %v2140_v58 = vadd.s32 4294967294, %v330_v44  ;;  %vm481_vm5 = vcmp.gt.s32.totalorder %v480_v30, 0  ;;  %v251_v57 = vadd.s32 3, %v3155_v61  ;;  %v348_v56 = vsub.s32 4, %v3111_v38 }
  0xa5   : > { %v237_v45 = vor.u32 4788187, %v236_v63  ;;  %v240_v50 = vcvt.s32.f32 %v233_v36  ;;  %v482_v27 = vsel %vm481_vm5, %v480_v30, 0  ;;  %v318_v53 = vadd.s32 %v3072_v28, %v3078_v34 }
  0xa6   : > { %vm2141_vm6 = vcmp.lt.s32.totalorder %v2140_v58, 0  ;;  %v477_v54 = vand.u32 8388607, %v470_v59  ;;  %v484_v29 = vand.u32 31, %v482_v27  ;;  %vm3177_vm7 = vcmp.le.f32.partialorder %v262_v25, 0.7853982 }
  0xa7   : > { %v238_v48 = vand.u32 2147483647, %v237_v45  ;;  %v333_v37 = vsel %vm2141_vm6, 0, %v2140_v58  ;;  %v421_v41 = vmul.u32 %v3103_v43, %v405_v22  ;;  %vm423_vm8 = vc.u32 %v3162_v32, %v3165_v40 }
  0xa8   : > { %v334_v31 = vsub.s32 32, %v333_v37  ;;  %v335_v28 = vshll.u32 %v3126_v23, %v333_v37  ;;  %v338_v34 = vsub.s32 4294967266, %v333_v37  ;;  %v424_v60 = vadd.s32 1, %v3166_v42 }
  0xa9   : > { %v241_v33 = vmul.f32 %v240_v50, %v238_v48  ;;  %v3186_v63 = vand.u32 3, %v251_v57  ;;  %v349_v25 = vsel %vm264_vm4, %v348_v56, %v3111_v38  ;;  %v485_v35 = vsub.s32 32, %v484_v29 }
  0xaa   : > { %v336_v30 = vshrl.u32 %v318_v53, %v334_v31  ;;  %v339_v44 = vadd.s32 127, %v338_v34  ;;  %v425_v43 = vsel %vm423_vm8, %v424_v60, %v3166_v42  ;;  %v3192_v22 = vshrl.u32 %v482_v27, 5 }
  0xab   : > { %v242_v36 = vxor.u32 2147483648, %v241_v33  ;;  %v426_v45 = vadd.s32 %v425_v43, %v421_v41  ;;  %v487_v50 = vshll.u32 %v2752_v47, %v484_v29  ;;  %v490_v52 = vshll.u32 %v2753_v49, %v484_v29 }
  0xac   : > { %v337_v38 = vor.u32 %v336_v30, %v335_v28  ;;  %v340_v48 = vshll.u32 %v339_v44, 23  ;;  %v493_v57 = vshll.u32 %v2754_v51, %v484_v29  ;;  %v488_v56 = vshrl.u32 %v2753_v49, %v485_v35 }
  0xad   : > { %v243_v23 = vsel %vm160_vm13, %v242_v36, %v241_v33  ;;  %v427_v42 = vadd.s32 536870912, %v426_v45  ;;  %v491_v27 = vshrl.u32 %v2754_v51, %v485_v35  ;;  %v3982_v37 = vmov 2102212464  }
  0xae   : > { %v246_v58 = vsel %vm3115_vm14, %v2985_v20, %v243_v23  ;;  %v341_v53 = vor.u32 4788187, %v340_v48  ;;  %v344_v33 = vcvt.s32.f32 %v337_v38  ;;  %v494_v41 = vshrl.u32 %v3982_v37, %v485_v35 }
  0xaf   : > { %2393 = vcosq.f32 %v246_v58  ;;  %v3205_v31 = vshrl.u32 %v427_v42, 30  ;;  %v478_v34 = vor.u32 8388608, %v477_v54  ;;  %v496_v46 = vshll.u32 %v3982_v37, %v484_v29 }
  0xb0   : > { %2395 = vsinq.f32 %v246_v58  ;;  %v497_v28 = vshrl.u32 %v2756_v55, %v485_v35  ;;  %vm254_vm9 = vcmp.eq.s32.totalorder %v3186_v63, 0  ;;  %v342_v60 = vand.u32 2147483647, %v341_v53 }
  0xb1   : > { %v3212_v49 = vsel %vm3177_vm7, 0, %v349_v25  ;;  %v499_v51 = vshll.u32 %v2756_v55, %v484_v29  ;;  %v500_v36 = vshrl.u32 %v2757_v62, %v485_v35  ;;  %vm253_vm10 = vcmp.lt.s32.totalorder %v3186_v63, 2 }
  0xb2   : > { %v429_v30 = vshll.u32 %v3205_v31, 30  ;;  %v489_v54 = vor.u32 %v488_v56, %v487_v50  ;;  %v492_v44 = vor.u32 %v491_v27, %v490_v52  ;;  %v498_v43 = vor.u32 %v497_v28, %v496_v46 }
  0xb3   : > { %v345_v23 = vmul.f32 %v344_v33, %v342_v60  ;;  %v495_v58 = vor.u32 %v494_v41, %v493_v57  ;;  %v501_v38 = vor.u32 %v500_v36, %v499_v51  ;;  %vm505_vm11 = vcmp.lt.s32.totalorder %v3192_v22, 4 }
  0xb4   : > { %v3219_v48 = vsub.s32 %v426_v45, %v429_v30  ;;  %v486_v25 = vshrl.u32 %v2752_v47, %v485_v35  ;;  %vm502_vm12 = vcmp.lt.s32.totalorder %v3192_v22, 1  ;;  %vm504_vm13 = vcmp.lt.s32.totalorder %v3192_v22, 3 }
  0xb5   : > { %vm257_vm14 = vcmp.eq.s32.totalorder %v3186_v63, 2  ;;  %v346_v55 = vxor.u32 2147483648, %v345_v23  ;;  %v355_v62 = vadd.s32 3, %v3212_v49  ;;  %v3226_v29 = vshll.u32 %v478_v34, 8 }
  0xb6   : > { %v432_v50 = vsub.s32 0, %v3219_v48  ;;  %vm503_vm15 = vcmp.lt.s32.totalorder %v3192_v22, 2  ;;  %v507_v45 = vsel %vm505_vm11, %v495_v58, 2102212464  ;;  %v511_v47 = vsel %vm505_vm11, %v498_v43, 920167782 }
  0xb7   : > { %v347_v35 = vsel %vm264_vm4, %v346_v55, %v345_v23  ;;  %v510_v52 = vsel %vm502_vm12, %v489_v54, %v492_v44  ;;  %v512_v57 = vsel %vm504_vm13, %v495_v58, %v511_v47  ;;  %v515_v42 = vsel %vm505_vm11, %v501_v38, 1326507024 }
  0xb8   : > { %v350_v27 = vsel %vm3177_vm7, %v2989_v21, %v347_v35  ;;  %v2143_v53 = vmin.u32 %v432_v50, %v3219_v48  ;;  %v506_v33 = vsel %vm502_vm12, %v486_v25, %v489_v54  ;;  %v514_v37 = vsel %vm502_vm12, %v492_v44, %v495_v58 }
  0xb9   : > { %v3243_v56 = vpop.eup %2393  ;;  %2397 = vcosq.f32 %v350_v27  ;;  %v508_v46 = vsel %vm504_vm13, %v492_v44, %v507_v45  ;;  %v516_v39 = vsel %vm504_vm13, %v498_v43, %v515_v42  ;;  %v513_v51 = vsel %vm503_vm15, %v510_v52, %v512_v57 }
  0xba   : > { %v3253_v41 = vpop.eup %2395  ;;  %v258_v34 = vxor.u32 2147483648, %v3243_v56  ;;  %2399 = vsinq.f32 %v350_v27  ;;  %v434_v60 = vclz %v2143_v53  ;;  %vm250_vm0 = vweird.f32 %v2985_v20 }
  0xbb   : > { %v255_v28 = vxor.u32 2147483648, %v3253_v41  ;;  %v517_v30 = vsel %vm503_vm15, %v514_v37, %v516_v39  ;;  %v3271_v54 = vstv %s574_s18  ;;  %v509_v25 = vsel %vm503_vm15, %v506_v33, %v508_v46 }
  0xbc   : > { %v259_v36 = vsel %vm257_vm14, %v258_v34, %v3253_v41  ;;  %v2144_v43 = vadd.s32 4294967294, %v434_v60  ;;  %v3279_v23 = vmul.u32.u64.low %v3226_v29, %v517_v30  ;;  %v3280_v58 = vmul.u32.u64.high %v3226_v29, %v517_v30, %v3279_v23 }
  0xbd   : > { %v256_v44 = vsel %vm254_vm9, %v3243_v56, %v255_v28  ;;  %v3287_v55 = vmul.u32.u64.low %v3226_v29, %v513_v51  ;;  %v3288_v50 = vmul.u32.u64.high %v3226_v29, %v513_v51, %v3287_v55  ;;  %v356_v47 = vand.u32 3, %v355_v62 }
  0xbe   : > { %v260_v38 = vsel %vm253_vm10, %v256_v44, %v259_v36  ;;  %v422_v35 = vadd.s32 %v3165_v40, %v3162_v32  ;;  %vm2145_vm1 = vcmp.lt.s32.totalorder %v2144_v43, 0  ;;  %v525_v27 = vmul.u32 %v3226_v29, %v509_v25 }
  0xbf   : > { %v261_v45 = vsel %vm250_vm0, nan, %v260_v38  ;;  %v437_v52 = vsel %vm2145_vm1, 0, %v2144_v43  ;;  %vm527_vm2 = vc.u32 %v3280_v58, %v3287_v55  ;;  %v528_v62 = vadd.s32 1, %v3288_v50 }
  0xc0   : > { %v575_v63 = vmul.f32 %v261_v45, %v2883_v0  ;;  %v438_v22 = vsub.s32 32, %v437_v52  ;;  %v439_v57 = vshll.u32 %v3219_v48, %v437_v52  ;;  %v442_v42 = vsub.s32 4294967266, %v437_v52 }
  0xc1   : > { %vm358_vm3 = vcmp.eq.s32.totalorder %v356_v47, 0  ;;  %vm361_vm4 = vcmp.eq.s32.totalorder %v356_v47, 2  ;;  %v529_v37 = vsel %vm527_vm2, %v528_v62, %v3288_v50  ;;  %v598_v48 = vmul.f32 0.999, %v2705_v15 }
  0xc2   : > { %v580_v53 = vmul.f32 %v3271_v54, %v575_v63  ;;  %v440_v32 = vshrl.u32 %v422_v35, %v438_v22  ;;  %v443_v40 = vadd.s32 127, %v442_v42  ;;  %v530_v36 = vadd.s32 %v529_v37, %v525_v27 }
  0xc3   : > { %v3305_v33 = vpop.eup %2397  ;;  %vm357_vm5 = vcmp.lt.s32.totalorder %v356_v47, 2  ;;  %v3314_v43 = vstv %s3297_s28  ;;  %vm354_vm6 = vweird.f32 %v2989_v21  ;;  %vm368_vm7 = vcmp.lt.s32.totalorder %v2995_v24, 0 }
  0xc4   : > { %v602_v46 = vmul.f32 %v580_v53, %v580_v53  ;;  %v3309_v29 = vpop.eup %2399  ;;  %v362_v39 = vxor.u32 2147483648, %v3305_v33  ;;  %v441_v60 = vor.u32 %v440_v32, %v439_v57  ;;  %v444_v51 = vshll.u32 %v443_v40, 23 }
  0xc5   : > { %v359_v30 = vxor.u32 2147483648, %v3309_v29  ;;  %v531_v25 = vadd.s32 536870912, %v530_v36  ;;  %v452_v47 = vsub.s32 4, %v3205_v31  ;;  %v3983_v32 = vand.u32 2147483647, %v2995_v24 }
  0xc6   : > { %v606_v44 = vmul.f32 0.001, %v602_v46  ;;  %v363_v23 = vsel %vm361_vm4, %v362_v39, %v3309_v29  ;;  %v445_v15 = vor.u32 4788187, %v444_v51  ;;  %v448_v38 = vcvt.s32.f32 %v441_v60 }
  0xc7   : > { %v360_v50 = vsel %vm358_vm3, %v3305_v33, %v359_v30  ;;  %v3326_v63 = vshrl.u32 %v531_v25, 30  ;;  %vm3339_vm8 = vcmp.le.f32.partialorder %v3983_v32, 0.7853982  ;;  %v586_v37 = vmul.f32 0.9, %v2721_v19 }
  0xc8   : > { %v3323_v45 = vadd.f32 %v606_v44, %v598_v48   ;;  %v364_v35 = vsel %vm357_vm5, %v360_v50, %v363_v23  ;;  %v446_v52 = vand.u32 2147483647, %v445_v15  ;;  %v590_v44 = vmul.f32 0.1, %v580_v53 }
  0xc9   : > { %v365_v22 = vsel %vm354_vm6, nan, %v364_v35  ;;  %v533_v27 = vshll.u32 %v3326_v63, 30  ;;  %v453_v15 = vsel %vm368_vm7, %v452_v47, %v3205_v31  ;;  %v599_v19 = vmul.f32 0.999, %v2701_v14 }
  0xca   : > { %v620_v57 = vmul.f32 %v3314_v43, %v3323_v45  ;;  %v449_v42 = vmul.f32 %v448_v38, %v446_v52  ;;  %v576_v62 = vmul.f32 %v365_v22, %v2885_v1  ;;  %v3354_v35 = vadd.f32 %v590_v44, %v586_v37  }
  0xcb   : > { %v534_v60 = vsub.s32 %v530_v36, %v533_v27  ;;  %v455_v53 = vsel %vm3339_vm8, 0, %v453_v15  ;;  %v3358_v22 = vstv %s584_s29  ;;  %v526_v40 = vadd.s32 %v3287_v55, %v3280_v58 }
  0xcc   : > { %v624_v48 = vadd.f32 1e-16, %v620_v57  ;;  %v450_v46 = vxor.u32 2147483648, %v449_v42  ;;  %v581_v51 = vmul.f32 %v3271_v54, %v576_v62  ;;  %v459_v31 = vadd.s32 3, %v455_v53 }
  0xcd   : > { %v536_v38 = vsub.s32 0, %v534_v60  ;;  %v615_v27 = vmul.f32 %v3358_v22, %v3354_v35  ;;  %v587_v37 = vmul.f32 0.9, %v2717_v18  ;;  %vm458_vm13 = vweird.f32 %v2995_v24 }
  0xce   : > { %2401 = vrsqrt.f32 %v624_v48  ;;  %v451_v23 = vsel %vm368_vm7, %v450_v46, %v449_v42  ;;  %v603_v50 = vmul.f32 %v581_v51, %v581_v51  ;;  %v460_v32 = vand.u32 3, %v459_v31 }
  0xcf   : > { %v454_v25 = vsel %vm3339_vm8, %v2995_v24, %v451_v23  ;;  %v2147_v36 = vmin.u32 %v536_v38, %v534_v60  ;;  %v591_v44 = vmul.f32 0.1, %v581_v51  ;;  %vm472_vm14 = vcmp.lt.s32.totalorder %v3065_v26, 0 }
  0xd0   : > { %2403 = vcosq.f32 %v454_v25  ;;  %v607_v52 = vmul.f32 0.001, %v603_v50  ;;  %vm465_vm10 = vcmp.eq.s32.totalorder %v460_v32, 2  ;;  %vm461_vm11 = vcmp.lt.s32.totalorder %v460_v32, 2 }
  0xd1   : > { %2405 = vsinq.f32 %v454_v25  ;;  %v538_v57 = vclz %v2147_v36  ;;  %vm462_vm12 = vcmp.eq.s32.totalorder %v460_v32, 0  ;;  %vm3390_vm1 = vcmp.le.f32.partialorder %v470_v59, 0.7853982 }
  0xd2   : > { %v3360_v14 = vadd.f32 %v607_v52, %v599_v19  }
  0xd3   : > { %v2148_v47 = vadd.s32 4294967294, %v538_v57 }
  0xd4   : > { %v3986_v42 = vmov %v3360_v14 }
  0xd5   : > { %v621_v62 = vmul.f32 %v3314_v43, %v3986_v42  ;;  %vm2149_vm9 = vcmp.lt.s32.totalorder %v2148_v47, 0 }
  0xd6   : > { %v541_v46 = vsel %vm2149_vm9, 0, %v2148_v47  ;;  %v733_v47 = vand.u32 3, %v3155_v61  ;;  %v556_v61 = vsub.s32 4, %v3326_v63 }
  0xd7   : > { %v625_v23 = vadd.f32 1e-16, %v621_v62  ;;  %v542_v15 = vsub.s32 32, %v541_v46  ;;  %v543_v14 = vshll.u32 %v534_v60, %v541_v46  ;;  %v546_v38 = vsub.s32 4294967266, %v541_v46 }
  0xd8   : > { %v2402_v48 = vpop.eup %2401  ;;  %v3375_v60 = vadd.f32 %v591_v44, %v587_v37   ;;  %vm735_vm15 = vcmp.eq.s32.totalorder %v733_v47, 0  ;;  %vm738_vm2 = vcmp.eq.s32.totalorder %v733_v47, 2  ;;  %vm734_vm5 = vcmp.lt.s32.totalorder %v733_v47, 2 }
  0xd9   : > { %v632_v25 = vmul.f32 %v2402_v48, %v615_v27  ;;  %2407 = vrsqrt.f32 %v625_v23  ;;  %v544_v50 = vshrl.u32 %v526_v40, %v542_v15  ;;  %v547_v36 = vadd.s32 127, %v546_v38 }
  0xda   : > { %v3369_v19 = vpop.eup %2403  ;;  %v836_v48 = vand.u32 3, %v3212_v49  ;;  %v616_v37 = vmul.f32 %v3358_v22, %v3375_v60  ;;  %v600_v15 = vmul.f32 0.999, %v2697_v13  ;;  %v737_v59 = vsel %vm735_vm15, %v3243_v56, %v255_v28 }
  0xdb   : > { %v3372_v8 = vsub.f32 %v2737_v8, %v632_v25   ;;  %v2406_v55 = vpop.eup %2405  ;;  %v466_v18 = vxor.u32 2147483648, %v3369_v19  ;;  %v545_v52 = vor.u32 %v544_v50, %v543_v14  ;;  %v548_v31 = vshll.u32 %v547_v36, 23 }
  0xdc   : > { %v463_v51 = vxor.u32 2147483648, %v2406_v55  ;;  %vm838_vm3 = vcmp.eq.s32.totalorder %v836_v48, 0  ;;  %vm841_vm4 = vcmp.eq.s32.totalorder %v836_v48, 2  ;;  %v939_v25 = vand.u32 3, %v455_v53 }
  0xdd   : > { %v3987_v58 = vmov %v3372_v8  ;;  %v467_v57 = vsel %vm465_vm10, %v466_v18, %v2406_v55  ;;  %v549_v62 = vor.u32 4788187, %v548_v31  ;;  %v552_v40 = vcvt.s32.f32 %v545_v52 }
  0xde   : > { %v464_v27 = vsel %vm462_vm12, %v3369_v19, %v463_v51  ;;  %v557_v52 = vsel %vm472_vm14, %v556_v61, %v3326_v63  ;;  %v740_v13 = vsel %vm738_vm2, %v258_v34, %v3253_v41  ;;  %vm837_vm7 = vcmp.lt.s32.totalorder %v836_v48, 2 }
  0xdf   : > { %v468_v8 = vsel %vm461_vm11, %v464_v27, %v467_v57  ;;  %v550_v46 = vand.u32 2147483647, %v549_v62  ;;  %v840_v28 = vsel %vm838_vm3, %v3305_v33, %v359_v30  ;;  %v843_v63 = vsel %vm841_vm4, %v362_v39, %v3309_v29 }
  0xe0   : > { %v469_v32 = vsel %vm458_vm13, nan, %v468_v8  ;;  %vm941_vm8 = vcmp.eq.s32.totalorder %v939_v25, 0  ;;  %vm944_vm9 = vcmp.eq.s32.totalorder %v939_v25, 2  ;;  %v559_v34 = vsel %vm3390_vm1, 0, %v557_v52 }
  0xe1   : > { %v577_v44 = vmul.f32 %v469_v32, %v2887_v2  ;;  %v553_v49 = vmul.f32 %v552_v40, %v550_v46  ;;  %v741_v30 = vsel %vm734_vm5, %v737_v59, %v740_v13  ;;  %v844_v62 = vsel %vm837_vm7, %v840_v28, %v843_v63 }
  0xe2   : > { %v563_v40 = vadd.s32 3, %v559_v34  ;;  %vm940_vm10 = vcmp.lt.s32.totalorder %v939_v25, 2  ;;  %v943_v33 = vsel %vm941_vm8, %v3369_v19, %v463_v51  ;;  %v946_v29 = vsel %vm944_vm9, %v466_v18, %v2406_v55 }
  0xe3   : > { %v2408_v14 = vpop.eup %2407  ;;  %v582_v38 = vmul.f32 %v3271_v54, %v577_v44  ;;  %v554_v50 = vxor.u32 2147483648, %v553_v49  ;;  %v742_v8 = vsel %vm250_vm0, nan, %v741_v30  ;;  %v845_v48 = vsel %vm354_vm6, nan, %v844_v62 }
  0xe4   : > { %v633_v36 = vmul.f32 %v2408_v14, %v616_v37  ;;  %v947_v46 = vsel %vm940_vm10, %v943_v33, %v946_v29  ;;  %v564_v37 = vand.u32 3, %v563_v40  ;;  %v588_v47 = vmul.f32 0.9, %v2713_v17 }
  0xe5   : > { %v604_v31 = vmul.f32 %v582_v38, %v582_v38  ;;  %v555_v53 = vsel %vm472_vm14, %v554_v50, %v553_v49  ;;  %v592_v61 = vmul.f32 0.1, %v582_v38  ;;  %v1042_v44 = vand.u32 3, %v559_v34 }
  0xe6   : > { %v3408_v9 = vsub.f32 %v2733_v9, %v633_v36   ;;  %v558_v56 = vsel %vm3390_vm1, %v3065_v26, %v555_v53  ;;  %v1052_v19 = vmul.f32 %v742_v8, %v2883_v0  ;;  %v1053_v55 = vmul.f32 %v845_v48, %v2885_v1 }
  0xe7   : > { %v608_v41 = vmul.f32 0.001, %v604_v31  ;;  %2409 = vcosq.f32 %v558_v56  ;;  %v948_v18 = vsel %vm458_vm13, nan, %v947_v46  ;;  %vm566_vm0 = vcmp.eq.s32.totalorder %v564_v37, 0 }
  0xe8   : > { %v3990_v57 = vmov %v3408_v9  ;;  %2411 = vsinq.f32 %v558_v56  ;;  %vm569_vm11 = vcmp.eq.s32.totalorder %v564_v37, 2  ;;  %v3436_v17 = vadd.f32 %v592_v61, %v588_v47  }
  0xe9   : > { %v3421_v9 = vadd.f32 %v608_v41, %v600_v15   ;;  %vm1047_vm6 = vcmp.eq.s32.totalorder %v1042_v44, 2  ;;  %vm1044_vm12 = vcmp.eq.s32.totalorder %v1042_v44, 0  ;;  %v1054_v49 = vmul.f32 %v948_v18, %v2887_v2 }
  0xea   : > { %v3992_v21 = vmov %v3436_v17  ;;  %v1056_v15 = vadd.f32 %v1053_v55, %v1052_v19  ;;  %vm565_vm14 = vcmp.lt.s32.totalorder %v564_v37, 2  ;;  %vm1043_vm15 = vcmp.lt.s32.totalorder %v1042_v44, 2 }
  0xeb   : > { %v3991_v27 = vmov %v3421_v9  ;;  %vm562_vm1 = vweird.f32 %v3065_v26  ;;  %v617_v50 = vmul.f32 %v3358_v22, %v3992_v21  ;;  %v601_v9 = vmul.f32 0.999, %v2693_v12 }
  0xec   : > { %v622_v39 = vmul.f32 %v3314_v43, %v3991_v27  ;;  %v1057_v52 = vadd.f32 %v1056_v15, %v1054_v49  ;;  %v4008_v15 = vmov %v3323_v45  ;;  %v4011_v18 = vmov %v3375_v60 }
  0xed   :  { %v3536_v55 = vadd.f32 (%p3477_p0), %v3990_v57, %v2895_v5 }
  0xee   : > { %v626_v32 = vadd.f32 1e-16, %v622_v39  ;;  %v589_v39 = vmul.f32 0.9, %v2709_v16 }
  0xef   :  { %v1196_v49 = vand.u32 (%p3477_p0), 2147483647, %v3536_v55 }
  0xf0   : > { %2413 = vrsqrt.f32 %v626_v32 }
  0xf1   : > { %v2410_v20 = vpop.eup %2409  ;;  %v1203_v5 = vand.u32 (%p3477_p0), 8388607, %v1196_v49 }
  0xf2   : > { %v2412_v51 = vpop.eup %2411  ;;  %v570_v23 = vxor.u32 2147483648, %v2410_v20 }
  0xf3   : > { %v567_v14 = vxor.u32 2147483648, %v2412_v51 }
  0xf4   : > { %v571_v38 = vsel %vm569_vm11, %v570_v23, %v2412_v51  ;;  %v1049_v24 = vsel %vm1047_vm6, %v570_v23, %v2412_v51 }
  0xf5   : > { %v568_v25 = vsel %vm566_vm0, %v2410_v20, %v567_v14  ;;  %v1046_v36 = vsel %vm1044_vm12, %v2410_v20, %v567_v14  ;;  %v4007_v14 = vmov %v3986_v42 }
  0xf6   : > { %v572_v17 = vsel %vm565_vm14, %v568_v25, %v571_v38  ;;  %v1050_v59 = vsel %vm1043_vm15, %v1046_v36, %v1049_v24 }
  0xf7   : > { %v573_v31 = vsel %vm562_vm1, nan, %v572_v17  ;;  %v1051_v13 = vsel %vm562_vm1, nan, %v1050_v59  ;;  %v4010_v17 = vmov %v3992_v21 }
  0xf8   : > { %v578_v28 = vmul.f32 %v573_v31, %v2891_v3  ;;  %v1055_v63 = vmul.f32 %v1051_v13, %v2891_v3  ;;  %v4006_v13 = vmov %v3991_v27 }
  0xfa   : > { %v2414_v53 = vpop.eup %2413  ;;  %v583_v26 = vmul.f32 %v3271_v54, %v578_v28  ;;  %v1058_v41 = vadd.f32 %v1057_v52, %v1055_v63 }
  0xfb   : > { %v634_v56 = vmul.f32 %v2414_v53, %v617_v50 }
  0xfc   : > { %v605_v30 = vmul.f32 %v583_v26, %v583_v26  ;;  %1059 = vadd.xlane.f32.xlu0 %v1058_v41  ;;  %v593_v8 = vmul.f32 0.1, %v583_v26  ;;  %v2758_v41 = vmov (%p3477_p0), 683565275  }
  0xfd   : > { %v3446_v10 = vsub.f32 %v2729_v10, %v634_v56  }
  0xfe   : > { %v609_v62 = vmul.f32 0.001, %v605_v30  ;;  %v3454_v16 = vadd.f32 %v593_v8, %v589_v39   ;;  %v4016_v8 = vmov %v3987_v58  ;;  %v2759_v30 = vmov (%p3477_p0), 2475754826  }
  0xff   : > { %v3993_v34 = vmov %v3446_v10  ;;  %v2761_v39 = vmov (%p3477_p0), 2102212464  }
 0x100   : > { %v3449_v12 = vadd.f32 %v609_v62, %v601_v9   ;;  %v3995_v54 = vmov %v3454_v16  ;;  %v4015_v9 = vmov %v3990_v57  ;;  %v3542_v23 = vadd.f32 (%p3477_p0), %v3993_v34, %v2899_v6 }
 0x101   : > { %v618_v10 = vmul.f32 %v3358_v22, %v3995_v54  ;;  %v3532_v22 = vadd.f32 (%p3477_p0), %v3987_v58, %v2893_v4  ;;  %v1199_v4 = vand.u32 (%p3477_p0), 2139095040, %v3536_v55  ;;  %v1204_v6 = vor.u32 (%p3477_p0), 8388608, %v1203_v5 }
 0x102   : > { %v3994_v40 = vmov %v3449_v12  ;;  %v1303_v24 = vand.u32 (%p3477_p0), 2139095040, %v3542_v23  ;;  %v1300_v53 = vand.u32 (%p3477_p0), 2147483647, %v3542_v23 }
 0x103   : > { %v623_v33 = vmul.f32 %v3314_v43, %v3994_v40  ;;  %v1092_v20 = vand.u32 (%p3477_p0), 2147483647, %v3532_v22  ;;  %v1095_v51 = vand.u32 (%p3477_p0), 2139095040, %v3532_v22  ;;  %v1200_v14 = vshrl.u32 (%p3477_p0), %v1199_v4, 23 }
 0x104   :  { %v1304_v17 = vshrl.u32 (%p3477_p0), %v1303_v24, 23  ;;  %v3554_v63 = vshll.u32 (%p3477_p0), %v1204_v6, 8  ;;  %vm1094_vm14 = vcmp.lt.s32.totalorder (%p3477_p0), %v3532_v22, 0 }
 0x105   : > { %v627_v29 = vadd.f32 1e-16, %v623_v33  ;;  %v1096_v38 = vshrl.u32 (%p3477_p0), %v1095_v51, 23  ;;  %v1099_v18 = vand.u32 (%p3477_p0), 8388607, %v1092_v20  ;;  %v2170_v36 = vadd.s32 (%p3477_p0), 4294967169, %v1200_v14 }
 0x106   :  { %v3556_v56 = vadd.s32 (%p3477_p0), 4294967169, %v1304_v17  ;;  %v2760_v33 = vmov (%p3477_p0), 2131351028  }
 0x107   : > { %2415 = vrsqrt.f32 %v627_v29  ;;  %v2166_v15 = vadd.s32 (%p3477_p0), 4294967169, %v1096_v38  ;;  %v1100_v50 = vor.u32 (%p3477_p0), 8388608, %v1099_v18  ;;  %v1206_v52 = vadd.s32 (%p3477_p0), 1, %v2170_v36 }
 0x109   :  { %v1102_v25 = vadd.s32 (%p3477_p0), 1, %v2166_v15  ;;  %v3552_v28 = vshll.u32 (%p3477_p0), %v1100_v50, 8  ;;  %vm1207_vm2 = vcmp.gt.s32.totalorder (%p3477_p0), %v1206_v52, 0 }
 0x10a   :  { %v1208_v51 = vsel (%p3477_p0), %vm1207_vm2, %v1206_v52, 0 }
 0x10b   :  { %vm1103_vm13 = vcmp.gt.s32.totalorder (%p3477_p0), %v1102_v25, 0  ;;  %v1209_v4 = vshrl.u32 (%p3477_p0), %v1208_v51, 5  ;;  %v1210_v5 = vand.u32 (%p3477_p0), 31, %v1208_v51 }
 0x10c   :  { %v1104_v59 = vsel (%p3477_p0), %vm1103_vm13, %v1102_v25, 0 }
 0x10d   :  { %v1105_v31 = vshrl.u32 (%p3477_p0), %v1104_v59, 5  ;;  %v1106_v13 = vand.u32 (%p3477_p0), 31, %v1104_v59  ;;  %v1211_v17 = vsub.s32 (%p3477_p0), 32, %v1210_v5  ;;  %vm1228_vm8 = vcmp.lt.s32.totalorder (%p3477_p0), %v1209_v4, 1 }
 0x10e   :  { %vm1229_vm10 = vcmp.lt.s32.totalorder (%p3477_p0), %v1209_v4, 2  ;;  %vm1230_vm0 = vcmp.lt.s32.totalorder (%p3477_p0), %v1209_v4, 3  ;;  %vm1231_vm11 = vcmp.lt.s32.totalorder (%p3477_p0), %v1209_v4, 4 }
 0x10f   :  { %v1107_v26 = vsub.s32 (%p3477_p0), 32, %v1106_v13  ;;  %v1109_v9 = vshll.u32 (%p3477_p0), %v2758_v41, %v1106_v13  ;;  %v1112_v62 = vshll.u32 (%p3477_p0), %v2759_v30, %v1106_v13  ;;  %v1115_v29 = vshll.u32 (%p3477_p0), %v2760_v33, %v1106_v13 }
 0x110   :  { %v1118_v8 = vshll.u32 (%p3477_p0), %v2761_v39, %v1106_v13  ;;  %vm1124_vm3 = vcmp.lt.s32.totalorder (%p3477_p0), %v1105_v31, 1  ;;  %vm1125_vm4 = vcmp.lt.s32.totalorder (%p3477_p0), %v1105_v31, 2  ;;  %vm1126_vm5 = vcmp.lt.s32.totalorder (%p3477_p0), %v1105_v31, 3 }
 0x111   : > { %v2416_v48 = vpop.eup %2415  ;;  %vm1127_vm7 = vcmp.lt.s32.totalorder (%p3477_p0), %v1105_v31, 4  ;;  %v1217_v31 = vshrl.u32 (%p3477_p0), %v2760_v33, %v1211_v17 }
 0x112   : > { %v635_v32 = vmul.f32 %v2416_v48, %v618_v10  ;;  %v4014_v10 = vmov %v3993_v34 }
 0x113   :  { %v2762_v10 = vmov (%p3477_p0), 920167782  }
 0x114   : > { %v3459_v11 = vsub.f32 %v2725_v11, %v635_v32   ;;  %v1121_v48 = vshll.u32 (%p3477_p0), %v2762_v10, %v1106_v13  ;;  %v1108_v32 = vshrl.u32 (%p3477_p0), %v2758_v41, %v1107_v26  ;;  %v1225_v51 = vshll.u32 (%p3477_p0), %v2762_v10, %v1210_v5 }
 0x116   : > { %v3996_v46 = vmov %v3459_v11 }
 0x189   : > { %v1060_v12 = vpop.xlane.xlu0 %1059 }
 0x18a   : > { %v1061_v43 = vrot.slane %v1060_v12, 4 }
 0x18c   : > { %v1062_v37 = vadd.f32 %v1061_v43, %v1060_v12  ;;  %v4005_v12 = vmov %v3994_v40  ;;  %v1113_v43 = vshrl.u32 (%p3477_p0), %v2760_v33, %v1107_v26 }
 0x18d   :  { %v1110_v12 = vshrl.u32 (%p3477_p0), %v2759_v30, %v1107_v26 }
 0x18e   : > { %v1063_v47 = vrot.slane %v1062_v37, 2 }
 0x190   : > { %v1064_v61 = vadd.f32 %v1063_v47, %v1062_v37  ;;  %v1116_v37 = vshrl.u32 (%p3477_p0), %v2761_v39, %v1107_v26  ;;  %v1119_v47 = vshrl.u32 (%p3477_p0), %v2762_v10, %v1107_v26 }
 0x192   : > { %v1065_v44 = vrot.slane %v1064_v61, 1  ;;  %v1120_v38 = vor.u32 (%p3477_p0), %v1119_v47, %v1118_v8  ;;  %v1212_v8 = vshrl.u32 (%p3477_p0), %v2758_v41, %v1211_v17  ;;  %v1216_v47 = vshll.u32 (%p3477_p0), %v2759_v30, %v1210_v5 }
 0x194   : > { %v1066_v19 = vadd.f32 %v1065_v44, %v1064_v61  ;;  %v2763_v61 = vmov (%p3477_p0), 1326507024   ;;  %v1133_v36 = vsel (%p3477_p0), %vm1127_vm7, %v1120_v38, 920167782 }
 0x195   :  { %v1122_v44 = vshrl.u32 (%p3477_p0), %v2763_v61, %v1107_v26  ;;  %v1213_v26 = vshll.u32 (%p3477_p0), %v2758_v41, %v1210_v5 }
 0x196   : > { %2217 = vpush %v1066_v19  ;;  %v4012_v19 = vmov %v3354_v35 }
 0x197   :  { %v1111_v19 = vor.u32 (%p3477_p0), %v1110_v12, %v1109_v9  ;;  %v1123_v18 = vor.u32 (%p3477_p0), %v1122_v44, %v1121_v48  ;;  %v1219_v44 = vshll.u32 (%p3477_p0), %v2760_v33, %v1210_v5 }
 0x199   :  { %v1128_v15 = vsel (%p3477_p0), %vm1124_vm3, %v1108_v32, %v1111_v19  ;;  %v1137_v6 = vsel (%p3477_p0), %vm1127_vm7, %v1123_v18, 1326507024  ;;  %v1226_v18 = vshrl.u32 (%p3477_p0), %v2763_v61, %v1211_v17 }
 0x19a   :  { %v1138_v13 = vsel (%p3477_p0), %vm1126_vm5, %v1120_v38, %v1137_v6 }
 0x1c7   : > { %s2218_s30 = spop %2217 }
 0x1c8   : > { %s1069_s10 = smul.f32 0.00048828125, %s2218_s30 }
 0x1ca   : > { %s1070_s11 = ssub.f32 %s1068_s3, %s1069_s10  ;;  %s2764_s3 = smov (%p3477_p0), [#allocation16]  }
 0x1cb   :  { %s2042_s30 = sshll.u32 (%p3477_p0), %s2764_s3, 4  ;;  %s2043_s30 = int_to_ptr.vmem [resolvable:$true] %s2042_s30 }
 0x1cc   : > { %s1071_s13 = ssub.f32 %s1070_s11, %s2889_s0  ;;  %s2557_s10 = scalar_lea.vmem (%p3477_p0), %s2043_s30, 512 }
 0x1cd   :  { %p2558_p1 = scmp.ne.s32.totalorder (%p3477_p0), %s2043_s30, %s2557_s10  ;;  %p2562_p2 = scmp.lt.s32.totalorder (%p3477_p0), %s2043_s30, %s2043_s30 }
 0x1ce   : > { %s1074_s17 = smul.f32 0.1, %s1071_s13  ;;  %p2563_p3 = scmp.lt.s32.totalorder (%p3477_p0), %s2557_s10, %s2557_s10 }
 0x1cf   : > { %s1077_s19 = smul.f32 %s1071_s13, %s1071_s13 }
 0x1d0   : > { %s3466_s24 = sadd.f32 %s1074_s17, %s1073_s14   ;;  %p2564_p4 = por (%p3477_p0), %p2563_p3, %p2562_p2 }
 0x1d1   : > { %s1078_s15 = smul.f32 0.001, %s1077_s19 }
 0x1d2   : > { %s3997_s5 = smov %s3466_s24  ;;  %p2565_p5 = pnand (%p3477_p0), %p2564_p4, %p2558_p1 }
 0x1d3   : > { %s1080_s2 = smul.f32 %s3997_s5, %s1072_s12  ;;  %s3469_s23 = sadd.f32 %s1078_s15, %s1076_s16  }
 0x1d4   : > { %s4003_s24 = smov %s3997_s5 }
 0x1d5   : > { %s3998_s20 = smov %s3469_s23 }
 0x1d6   : > { %s1081_s21 = smul.f32 %s3998_s20, %s3297_s28  ;;  %s4001_s23 = smov %s3998_s20 }
 0x1d8   : > { %s1082_s4 = sadd.f32 1e-16, %s1081_s21 }
 0x1da   : > { %v1083_v11 = vstv %s1082_s4 }
 0x1db   : > { %2417 = vrsqrt.f32 %v1083_v11  ;;  %v4013_v11 = vmov %v3996_v46 }
 0x1dc   :  { %v1114_v11 = vor.u32 (%p3477_p0), %v1113_v43, %v1112_v62 }
 0x1de   :  { %v1132_v24 = vsel (%p3477_p0), %vm1124_vm3, %v1111_v19, %v1114_v11  ;;  %v1220_v19 = vshrl.u32 (%p3477_p0), %v2761_v39, %v1211_v17 }
 0x1e5   : > { %v2418_v16 = vpop.eup %2417 }
 0x1e6   : > { %2219 = vpush %v2418_v16  ;;  %v4009_v16 = vmov %v3995_v54 }
 0x1e7   :  { %v1117_v16 = vor.u32 (%p3477_p0), %v1116_v37, %v1115_v29  ;;  %v1214_v37 = vshrl.u32 (%p3477_p0), %v2759_v30, %v1211_v17 }
 0x1e9   :  { %v1129_v14 = vsel (%p3477_p0), %vm1127_vm7, %v1117_v16, 2102212464  ;;  %v1136_v25 = vsel (%p3477_p0), %vm1124_vm3, %v1114_v11, %v1117_v16  ;;  %v1134_v52 = vsel (%p3477_p0), %vm1126_vm5, %v1117_v16, %v1133_v36  ;;  %v1223_v16 = vshrl.u32 (%p3477_p0), %v2762_v10, %v1211_v17 }
 0x1ea   :  { %v1130_v50 = vsel (%p3477_p0), %vm1126_vm5, %v1114_v11, %v1129_v14  ;;  %v1135_v9 = vsel (%p3477_p0), %vm1125_vm4, %v1132_v24, %v1134_v52  ;;  %v1139_v62 = vsel (%p3477_p0), %vm1125_vm4, %v1136_v25, %v1138_v13  ;;  %v1222_v11 = vshll.u32 (%p3477_p0), %v2761_v39, %v1210_v5 }
 0x1eb   :  { %v1131_v59 = vsel (%p3477_p0), %vm1125_vm4, %v1128_v15, %v1130_v50  ;;  %v3583_v48 = vmul.u32.u64.low (%p3477_p0), %v3552_v28, %v1139_v62  ;;  %v3584_v32 = vmul.u32.u64.high %v3552_v28, %v1139_v62, %v3583_v48  ;;  %v1215_v38 = vor.u32 (%p3477_p0), %v1214_v37, %v1213_v26 }
 0x1ec   :  { %v1147_v29 = vmul.u32 (%p3477_p0), %v3552_v28, %v1131_v59  ;;  %v3587_v12 = vmul.u32.u64.low (%p3477_p0), %v3552_v28, %v1135_v9  ;;  %v3588_v43 = vmul.u32.u64.high %v3552_v28, %v1135_v9, %v3587_v12  ;;  %v1218_v28 = vor.u32 (%p3477_p0), %v1217_v31, %v1216_v47 }
 0x1ed   :  { %v1221_v14 = vor.u32 (%p3477_p0), %v1220_v19, %v1219_v44  ;;  %v1310_v24 = vadd.s32 (%p3477_p0), 1, %v3556_v56  ;;  %v1224_v25 = vor.u32 (%p3477_p0), %v1223_v16, %v1222_v11  ;;  %v1227_v50 = vor.u32 (%p3477_p0), %v1226_v18, %v1225_v51 }
 0x1ee   :  { %vm1149_vm9 = vc.u32 (%p3477_p0), %v3584_v32, %v3587_v12  ;;  %v1150_v15 = vadd.s32 (%p3477_p0), 1, %v3588_v43  ;;  %v1232_v5 = vsel (%p3477_p0), %vm1228_vm8, %v1212_v8, %v1215_v38  ;;  %v1236_v6 = vsel (%p3477_p0), %vm1228_vm8, %v1215_v38, %v1218_v28 }
 0x1ef   :  { %v1233_v59 = vsel (%p3477_p0), %vm1231_vm11, %v1221_v14, 2102212464  ;;  %v1237_v52 = vsel (%p3477_p0), %vm1231_vm11, %v1224_v25, 920167782  ;;  %v1240_v13 = vsel (%p3477_p0), %vm1228_vm8, %v1218_v28, %v1221_v14  ;;  %v1241_v9 = vsel (%p3477_p0), %vm1231_vm11, %v1227_v50, 1326507024 }
 0x1f0   :  { %v1151_v36 = vsel (%p3477_p0), %vm1149_vm9, %v1150_v15, %v3588_v43  ;;  %v1234_v26 = vsel (%p3477_p0), %vm1230_vm0, %v1218_v28, %v1233_v59  ;;  %v1238_v56 = vsel (%p3477_p0), %vm1230_vm0, %v1221_v14, %v1237_v52  ;;  %vm1311_vm6 = vcmp.gt.s32.totalorder (%p3477_p0), %v1310_v24, 0 }
 0x1f1   :  { %v1152_v17 = vadd.s32 (%p3477_p0), %v1151_v36, %v1147_v29  ;;  %v3612_v62 = vadd.f32 (%p3477_p0), %v3996_v46, %v2901_v7  ;;  %v1239_v8 = vsel (%p3477_p0), %vm1229_vm10, %v1236_v6, %v1238_v56  ;;  %v1242_v43 = vsel (%p3477_p0), %vm1230_vm0, %v1224_v25, %v1241_v9 }
 0x1f2   :  { %v1235_v29 = vsel (%p3477_p0), %vm1229_vm10, %v1232_v5, %v1234_v26  ;;  %v1243_v37 = vsel (%p3477_p0), %vm1229_vm10, %v1240_v13, %v1242_v43  ;;  %v3619_v47 = vmul.u32.u64.low (%p3477_p0), %v3554_v63, %v1239_v8  ;;  %v3620_v31 = vmul.u32.u64.high %v3554_v63, %v1239_v8, %v3619_v47 }
 0x1f3   :  { %v1153_v48 = vadd.s32 (%p3477_p0), 536870912, %v1152_v17  ;;  %v3624_v19 = vmul.u32.u64.low (%p3477_p0), %v3554_v63, %v1243_v37  ;;  %v3625_v11 = vmul.u32.u64.high %v3554_v63, %v1243_v37, %v3624_v19  ;;  %v1312_v7 = vsel (%p3477_p0), %vm1311_vm6, %v1310_v24, 0 }
 0x1f4   :  { %v1307_v16 = vand.u32 (%p3477_p0), 8388607, %v1300_v53  ;;  %v1314_v51 = vand.u32 (%p3477_p0), 31, %v1312_v7  ;;  %v1251_v28 = vmul.u32 (%p3477_p0), %v3554_v63, %v1235_v29  ;;  %v1407_v4 = vand.u32 (%p3477_p0), 2139095040, %v3612_v62 }
 0x1f5   :  { %v1154_v44 = vshrl.u32 (%p3477_p0), %v1153_v48, 30  ;;  %v1254_v18 = vadd.s32 (%p3477_p0), 1, %v3620_v31  ;;  %vm1253_vm12 = vc.u32 (%p3477_p0), %v3625_v11, %v3619_v47  ;;  %v1313_v5 = vshrl.u32 (%p3477_p0), %v1312_v7, 5 }
 0x1f6   :  { %v1315_v14 = vsub.s32 (%p3477_p0), 32, %v1314_v51  ;;  %v1308_v25 = vor.u32 (%p3477_p0), 8388608, %v1307_v16  ;;  %v1408_v63 = vshrl.u32 (%p3477_p0), %v1407_v4, 23  ;;  %v1317_v59 = vshll.u32 (%p3477_p0), %v2758_v41, %v1314_v51 }
 0x1f7   :  { %v1155_v38 = vshll.u32 (%p3477_p0), %v1154_v44, 30  ;;  %v1255_v24 = vsel (%p3477_p0), %vm1253_vm12, %v1254_v18, %v3620_v31  ;;  %v1178_v6 = vsub.s32 (%p3477_p0), 4, %v1154_v44  ;;  %v1326_v52 = vshll.u32 (%p3477_p0), %v2761_v39, %v1314_v51 }
 0x1f8   :  { %v1256_v36 = vadd.s32 (%p3477_p0), %v1255_v24, %v1251_v28  ;;  %v1318_v56 = vshrl.u32 (%p3477_p0), %v2759_v30, %v1315_v14  ;;  %v1321_v9 = vshrl.u32 (%p3477_p0), %v2760_v33, %v1315_v14  ;;  %v1323_v48 = vshll.u32 (%p3477_p0), %v2760_v33, %v1314_v51 }
 0x1f9   :  { %v3632_v15 = vsub.s32 (%p3477_p0), %v1152_v17, %v1155_v38  ;;  %v1320_v17 = vshll.u32 (%p3477_p0), %v2759_v30, %v1314_v51  ;;  %v1324_v8 = vshrl.u32 (%p3477_p0), %v2761_v39, %v1315_v14  ;;  %v1327_v43 = vshrl.u32 (%p3477_p0), %v2762_v10, %v1315_v14 }
 0x1fa   :  { %v1257_v26 = vadd.s32 (%p3477_p0), 536870912, %v1256_v36  ;;  %v3648_v29 = vshll.u32 (%p3477_p0), %v1308_v25, 8  ;;  %v1148_v37 = vadd.s32 (%p3477_p0), %v3587_v12, %v3584_v32  ;;  %v1329_v19 = vshll.u32 (%p3477_p0), %v2762_v10, %v1314_v51 }
 0x1fb   :  { %v1158_v50 = vsub.s32 (%p3477_p0), 0, %v3632_v15  ;;  %v1330_v7 = vshrl.u32 (%p3477_p0), %v2763_v61, %v1315_v14  ;;  %v1179_v16 = vsel (%p3477_p0), %vm1094_vm14, %v1178_v6, %v1154_v44  ;;  %v1328_v28 = vor.u32 (%p3477_p0), %v1327_v43, %v1326_v52 }
 0x1fc   :  { %v3656_v38 = vshrl.u32 (%p3477_p0), %v1257_v26, 30  ;;  %v2178_v4 = vadd.s32 (%p3477_p0), 4294967169, %v1408_v63  ;;  %v1319_v24 = vor.u32 (%p3477_p0), %v1318_v56, %v1317_v59  ;;  %vm1335_vm15 = vcmp.lt.s32.totalorder (%p3477_p0), %v1313_v5, 4 }
 0x1fd   :  { %v2167_v13 = vmin.u32 (%p3477_p0), %v1158_v50, %v3632_v15  ;;  %v1322_v50 = vor.u32 (%p3477_p0), %v1321_v9, %v1320_v17  ;;  %v1316_v32 = vshrl.u32 (%p3477_p0), %v2758_v41, %v1315_v14  ;;  %v1325_v12 = vor.u32 (%p3477_p0), %v1324_v8, %v1323_v48 }
 0x1fe   :  { %v1259_v25 = vshll.u32 (%p3477_p0), %v3656_v38, 30  ;;  %vm1332_vm1 = vcmp.lt.s32.totalorder (%p3477_p0), %v1313_v5, 1  ;;  %v1331_v51 = vor.u32 (%p3477_p0), %v1330_v7, %v1329_v19  ;;  %vm1334_vm2 = vcmp.lt.s32.totalorder (%p3477_p0), %v1313_v5, 3 }
 0x1ff   :  { %v1160_v31 = vclz (%p3477_p0), %v2167_v13  ;;  %v1341_v13 = vsel (%p3477_p0), %vm1335_vm15, %v1328_v28, 920167782  ;;  %vm1333_vm3 = vcmp.lt.s32.totalorder (%p3477_p0), %v1313_v5, 2  ;;  %v1337_v63 = vsel (%p3477_p0), %vm1335_vm15, %v1325_v12, 2102212464 }
 0x200   :  { %v3661_v6 = vsub.s32 (%p3477_p0), %v1256_v36, %v1259_v25  ;;  %v1340_v26 = vsel (%p3477_p0), %vm1332_vm1, %v1319_v24, %v1322_v50  ;;  %v1336_v56 = vsel (%p3477_p0), %vm1332_vm1, %v1316_v32, %v1319_v24  ;;  %v1342_v9 = vsel (%p3477_p0), %vm1334_vm2, %v1325_v12, %v1341_v13 }
 0x201   :  { %v2168_v18 = vadd.s32 (%p3477_p0), 4294967294, %v1160_v31  ;;  %v1344_v48 = vsel (%p3477_p0), %vm1332_vm1, %v1322_v50, %v1325_v12  ;;  %v1338_v43 = vsel (%p3477_p0), %vm1334_vm2, %v1322_v50, %v1337_v63  ;;  %v1345_v31 = vsel (%p3477_p0), %vm1335_vm15, %v1331_v51, 1326507024 }
 0x202   :  { %v1262_v14 = vsub.s32 (%p3477_p0), 0, %v3661_v6  ;;  %vm3674_vm4 = vcmp.le.f32.partialorder (%p3477_p0), %v1092_v20, 0.7853982  ;;  %v1343_v7 = vsel (%p3477_p0), %vm1333_vm3, %v1340_v26, %v1342_v9  ;;  %v1414_v32 = vadd.s32 (%p3477_p0), 1, %v2178_v4 }
 0x203   :  { %vm2169_vm13 = vcmp.lt.s32.totalorder (%p3477_p0), %v2168_v18, 0  ;;  %v3684_v50 = vsel (%p3477_p0), %vm3674_vm4, 0, %v1179_v16  ;;  %v1339_v20 = vsel (%p3477_p0), %vm1333_vm3, %v1336_v56, %v1338_v43  ;;  %v1404_v51 = vand.u32 (%p3477_p0), 2147483647, %v3612_v62 }
 0x204   :  { %v1163_v44 = vsel (%p3477_p0), %vm2169_vm13, 0, %v2168_v18  ;;  %v2171_v19 = vmin.u32 (%p3477_p0), %v1262_v14, %v3661_v6  ;;  %v1346_v18 = vsel (%p3477_p0), %vm1334_vm2, %v1328_v28, %v1345_v31  ;;  %vm1415_vm5 = vcmp.gt.s32.totalorder (%p3477_p0), %v1414_v32, 0 }
 0x205   :  { %v1164_v59 = vsub.s32 (%p3477_p0), 32, %v1163_v44  ;;  %v1165_v17 = vshll.u32 (%p3477_p0), %v3632_v15, %v1163_v44  ;;  %v1168_v52 = vsub.s32 (%p3477_p0), 4294967266, %v1163_v44  ;;  %v1185_v4 = vadd.s32 (%p3477_p0), 3, %v3684_v50 }
 0x206   :  { %v1264_v12 = vclz (%p3477_p0), %v2171_v19  ;;  %v1416_v5 = vsel (%p3477_p0), %vm1415_vm5, %v1414_v32, 0  ;;  %v1252_v26 = vadd.s32 (%p3477_p0), %v3619_v47, %v3625_v11  ;;  %v1411_v14 = vand.u32 (%p3477_p0), 8388607, %v1404_v51 }
 0x207   :  { %v1166_v8 = vshrl.u32 (%p3477_p0), %v1148_v37, %v1164_v59  ;;  %v1169_v36 = vadd.s32 (%p3477_p0), 127, %v1168_v52  ;;  %v1347_v37 = vsel (%p3477_p0), %vm1333_vm3, %v1344_v48, %v1346_v18  ;;  %v1418_v56 = vand.u32 (%p3477_p0), 31, %v1416_v5 }
 0x208   :  { %v3689_v63 = vmul.u32.u64.low (%p3477_p0), %v3648_v29, %v1347_v37  ;;  %v3690_v59 = vmul.u32.u64.high %v3648_v29, %v1347_v37, %v3689_v63  ;;  %v2172_v28 = vadd.s32 (%p3477_p0), 4294967294, %v1264_v12  ;;  %vm1198_vm8 = vcmp.lt.s32.totalorder (%p3477_p0), %v3536_v55, 0 }
 0x209   :  { %v1167_v24 = vor.u32 (%p3477_p0), %v1166_v8, %v1165_v17  ;;  %v1170_v25 = vshll.u32 (%p3477_p0), %v1169_v36, 23  ;;  %v3693_v17 = vmul.u32.u64.low (%p3477_p0), %v3648_v29, %v1343_v7  ;;  %v3694_v52 = vmul.u32.u64.high %v3648_v29, %v1343_v7, %v3693_v17 }
 0x20a   :  { %vm2173_vm7 = vcmp.lt.s32.totalorder (%p3477_p0), %v2172_v28, 0  ;;  %v1355_v8 = vmul.u32 (%p3477_p0), %v3648_v29, %v1339_v20  ;;  %v3708_v19 = vand.u32 (%p3477_p0), 3, %v1185_v4  ;;  %v1282_v7 = vsub.s32 (%p3477_p0), 4, %v3656_v38 }
 0x20b   :  { %v1171_v13 = vor.u32 (%p3477_p0), 4788187, %v1170_v25  ;;  %v1174_v44 = vcvt.s32.f32 (%p3477_p0), %v1167_v24  ;;  %v1267_v48 = vsel (%p3477_p0), %vm2173_vm7, 0, %v2172_v28  ;;  %vm1357_vm9 = vc.u32 (%p3477_p0), %v3690_v59, %v3693_v17 }
 0x20c   :  { %v1268_v36 = vsub.s32 (%p3477_p0), 32, %v1267_v48  ;;  %v1269_v43 = vshll.u32 (%p3477_p0), %v3661_v6, %v1267_v48  ;;  %v1272_v31 = vsub.s32 (%p3477_p0), 4294967266, %v1267_v48  ;;  %v1358_v47 = vadd.s32 (%p3477_p0), 1, %v3694_v52 }
 0x20d   :  { %v1172_v16 = vand.u32 (%p3477_p0), 2147483647, %v1171_v13  ;;  %v1419_v18 = vsub.s32 (%p3477_p0), 32, %v1418_v56  ;;  %v3712_v29 = vshrl.u32 (%p3477_p0), %v1416_v5, 5  ;;  %vm3718_vm10 = vcmp.le.f32.partialorder (%p3477_p0), %v1196_v49, 0.7853982 }
 0x20e   :  { %v1270_v24 = vshrl.u32 (%p3477_p0), %v1252_v26, %v1268_v36  ;;  %v1273_v25 = vadd.s32 (%p3477_p0), 127, %v1272_v31  ;;  %v1359_v37 = vsel (%p3477_p0), %vm1357_vm9, %v1358_v47, %v3694_v52  ;;  %v1421_v20 = vshll.u32 (%p3477_p0), %v2758_v41, %v1418_v56 }
 0x20f   :  { %v1175_v9 = vmul.f32 (%p3477_p0), %v1174_v44, %v1172_v16  ;;  %v1360_v12 = vadd.s32 (%p3477_p0), %v1359_v37, %v1355_v8  ;;  %v1424_v13 = vshll.u32 (%p3477_p0), %v2759_v30, %v1418_v56  ;;  %v1427_v52 = vshll.u32 (%p3477_p0), %v2760_v33, %v1418_v56 }
 0x210   :  { %v1271_v63 = vor.u32 (%p3477_p0), %v1270_v24, %v1269_v43  ;;  %v1274_v28 = vshll.u32 (%p3477_p0), %v1273_v25, 23  ;;  %v1422_v49 = vshrl.u32 (%p3477_p0), %v2759_v30, %v1419_v18  ;;  %v1425_v4 = vshrl.u32 (%p3477_p0), %v2760_v33, %v1419_v18 }
 0x211   :  { %v1176_v11 = vxor.u32 (%p3477_p0), 2147483648, %v1175_v9  ;;  %v1361_v16 = vadd.s32 (%p3477_p0), 536870912, %v1360_v12  ;;  %v1412_v8 = vor.u32 (%p3477_p0), 8388608, %v1411_v14  ;;  %v1430_v15 = vshll.u32 (%p3477_p0), %v2761_v39, %v1418_v56 }
 0x212   :  { %v1275_v5 = vor.u32 (%p3477_p0), 4788187, %v1274_v28  ;;  %v1278_v26 = vcvt.s32.f32 (%p3477_p0), %v1271_v63  ;;  %v1431_v36 = vshrl.u32 (%p3477_p0), %v2762_v10, %v1419_v18  ;;  %vm1188_vm0 = vcmp.eq.s32.totalorder (%p3477_p0), %v3708_v19, 0 }
 0x213   :  { %v1177_v32 = vsel (%p3477_p0), %vm1094_vm14, %v1176_v11, %v1175_v9  ;;  %v1428_v9 = vshrl.u32 (%p3477_p0), %v2761_v39, %v1419_v18  ;;  %v3731_v48 = vshrl.u32 (%p3477_p0), %v1361_v16, 30  ;;  %v1283_v30 = vsel (%p3477_p0), %vm1198_vm8, %v1282_v7, %v3656_v38 }
 0x214   :  { %v1180_v44 = vsel (%p3477_p0), %vm3674_vm4, %v3532_v22, %v1177_v32  ;;  %v1276_v43 = vand.u32 (%p3477_p0), 2147483647, %v1275_v5  ;;  %v1433_v33 = vshll.u32 (%p3477_p0), %v2762_v10, %v1418_v56  ;;  %v1434_v31 = vshrl.u32 (%p3477_p0), %v2763_v61, %v1419_v18 }
 0x215   :  { %2419 = vcosq.f32 (%p3477_p0), %v1180_v44  ;;  %vm1187_vm11 = vcmp.lt.s32.totalorder (%p3477_p0), %v3708_v19, 2  ;;  %v1363_v47 = vshll.u32 (%p3477_p0), %v3731_v48, 30  ;;  %v1423_v14 = vor.u32 (%p3477_p0), %v1422_v49, %v1421_v20 }
 0x216   :  { %2421 = vsinq.f32 (%p3477_p0), %v1180_v44  ;;  %v1426_v11 = vor.u32 (%p3477_p0), %v1425_v4, %v1424_v13  ;;  %v1432_v39 = vor.u32 (%p3477_p0), %v1431_v36, %v1430_v15  ;;  %v1279_v24 = vmul.f32 (%p3477_p0), %v1278_v26, %v1276_v43 }
 0x217   : > { %s2220_s22 = spop %2219  ;;  %137 = sbr.rel (!%p3477_p0) target bundleno = 109 (0x6d), region = 101  ;;  %v1429_v25 = vor.u32 (%p3477_p0), %v1428_v9, %v1427_v52  ;;  %v1435_v37 = vor.u32 (%p3477_p0), %v1434_v31, %v1433_v33  ;;  %vm1439_vm6 = vcmp.lt.s32.totalorder (%p3477_p0), %v3712_v29, 4  ;;  %v1364_v32 = vsub.s32 (%p3477_p0), %v1360_v12, %v1363_v47 }
 0x218   : > { %s1086_s18 = smul.f32 %s2220_s22, %s1080_s2  ;;  %v1420_v44 = vshrl.u32 (%p3477_p0), %v2758_v41, %v1419_v18  ;;  %vm1436_vm12 = vcmp.lt.s32.totalorder (%p3477_p0), %v3712_v29, 1  ;;  %vm1438_vm14 = vcmp.lt.s32.totalorder (%p3477_p0), %v3712_v29, 3  ;;  %vm1191_vm15 = vcmp.eq.s32.totalorder (%p3477_p0), %v3708_v19, 2 }
 0x219   :  { %v1280_v10 = vxor.u32 (%p3477_p0), 2147483648, %v1279_v24  ;;  %v3750_v61 = vsel (%p3477_p0), %vm3718_vm10, 0, %v1283_v30  ;;  %v1452_v38 = vshll.u32 (%p3477_p0), %v1412_v8, 8  ;;  %v1366_v56 = vsub.s32 (%p3477_p0), 0, %v1364_v32 }
 0x21a   : > { %s3474_s25 = ssub.f32 %s2689_s25, %s1086_s18   ;;  %vm1437_vm1 = vcmp.lt.s32.totalorder (%p3477_p0), %v3712_v29, 2  ;;  %v1441_v7 = vsel (%p3477_p0), %vm1439_vm6, %v1429_v25, 2102212464  ;;  %v1445_v41 = vsel (%p3477_p0), %vm1439_vm6, %v1432_v39, 920167782  ;;  %v1444_v12 = vsel (%p3477_p0), %vm1436_vm12, %v1423_v14, %v1426_v11 }
 0x21b   :  { %v1281_v18 = vsel (%p3477_p0), %vm1198_vm8, %v1280_v10, %v1279_v24  ;;  %v1446_v20 = vsel (%p3477_p0), %vm1438_vm14, %v1429_v25, %v1445_v41  ;;  %v1449_v13 = vsel (%p3477_p0), %vm1439_vm6, %v1435_v37, 1326507024  ;;  %v2175_v52 = vmin.u32 (%p3477_p0), %v1366_v56, %v1364_v32 }
 0x21c   : > { %s3999_s29 = smov %s3474_s25  ;;  %v1284_v28 = vsel (%p3477_p0), %vm3718_vm10, %v3536_v55, %v1281_v18  ;;  %v1440_v16 = vsel (%p3477_p0), %vm1436_vm12, %v1420_v44, %v1423_v14  ;;  %v1448_v49 = vsel (%p3477_p0), %vm1436_vm12, %v1426_v11, %v1429_v25  ;;  %v1442_v26 = vsel (%p3477_p0), %vm1438_vm14, %v1426_v11, %v1441_v7 }
 0x21d   : > { %s4004_s25 = smov %s3999_s29  ;;  %2423 = vcosq.f32 (%p3477_p0), %v1284_v28  ;;  %v1450_v9 = vsel (%p3477_p0), %vm1438_vm14, %v1432_v39, %v1449_v13  ;;  %v1368_v8 = vclz (%p3477_p0), %v2175_v52  ;;  %v1447_v15 = vsel (%p3477_p0), %vm1437_vm1, %v1444_v12, %v1446_v20  ;;  %s1508_s23 = smul.f32 (%p3477_p0), 0.00048828125, %s3999_s29 }
 0x21e   :  { %2425 = vsinq.f32 %v1284_v28  ;;  %vm1184_vm13 = vweird.f32 %v3532_v22  ;;  %v1289_v43 = vadd.s32 3, %v3750_v61  ;;  %v1451_v30 = vsel %vm1437_vm1, %v1448_v49, %v1450_v9  ;;  %s3898_s25 = sld [smem:[#allocation8 + $0x4]] }
 0x21f   :  { %v3765_v63 = vpop.eup %2419  ;;  %v2176_v31 = vadd.s32 4294967294, %v1368_v8  ;;  %v3798_v47 = vmul.u32.u64.low %v1452_v38, %v1451_v30  ;;  %v3799_v14 = vmul.u32.u64.high %v1452_v38, %v1451_v30, %v3798_v47  ;;  %v1443_v39 = vsel %vm1437_vm1, %v1440_v16, %v1442_v26 }
 0x220   :  { %v3774_v4 = vpop.eup %2421  ;;  %v1192_v5 = vxor.u32 2147483648, %v3765_v63  ;;  %v3805_v24 = vmul.u32.u64.low %v1452_v38, %v1447_v15  ;;  %v3806_v25 = vmul.u32.u64.high %v1452_v38, %v1447_v15, %v3805_v24  ;;  %v1356_v44 = vadd.s32 %v3693_v17, %v3690_v59 }
 0x221   :  { %v1189_v6 = vxor.u32 2147483648, %v3774_v4  ;;  %vm2177_vm2 = vcmp.lt.s32.totalorder %v2176_v31, 0  ;;  %v1290_v10 = vand.u32 3, %v1289_v43  ;;  %v1459_v18 = vmul.u32 %v1452_v38, %v1443_v39 }
 0x222   :  { %v1193_v36 = vsel %vm1191_vm15, %v1192_v5, %v3774_v4  ;;  %v1371_v56 = vsel %vm2177_vm2, 0, %v2176_v31  ;;  %vm1461_vm3 = vc.u32 %v3799_v14, %v3805_v24  ;;  %v1462_v29 = vadd.s32 1, %v3806_v25 }
 0x223   :  { %v1190_v33 = vsel %vm1188_vm0, %v3765_v63, %v1189_v6  ;;  %v1372_v7 = vsub.s32 32, %v1371_v56  ;;  %v1373_v41 = vshll.u32 %v1364_v32, %v1371_v56  ;;  %v1376_v19 = vsub.s32 4294967266, %v1371_v56 }
 0x224   :  { %v1194_v11 = vsel %vm1187_vm11, %v1190_v33, %v1193_v36  ;;  %vm1292_vm4 = vcmp.eq.s32.totalorder %v1290_v10, 0  ;;  %vm1295_vm5 = vcmp.eq.s32.totalorder %v1290_v10, 2  ;;  %v1463_v28 = vsel %vm1461_vm3, %v1462_v29, %v3806_v25 }
 0x225   :  { %v3810_v37 = vsel %vm1184_vm13, nan, %v1194_v11  ;;  %v1374_v12 = vshrl.u32 %v1356_v44, %v1372_v7  ;;  %v1377_v20 = vadd.s32 127, %v1376_v19  ;;  %v1464_v16 = vadd.s32 %v1463_v28, %v1459_v18 }
 0x226   :  { %vm1291_vm7 = vcmp.lt.s32.totalorder %v1290_v10, 2  ;;  %vm1288_vm8 = vweird.f32 %v3536_v55  ;;  %v1386_v47 = vsub.s32 4, %v3731_v48  ;;  %vm1302_vm9 = vcmp.lt.s32.totalorder %v3542_v23, 0 }
 0x227   :  { %v3816_v13 = vpop.eup %2423  ;;  %v1375_v52 = vor.u32 %v1374_v12, %v1373_v41  ;;  %v1378_v32 = vshll.u32 %v1377_v20, 23  ;;  %v1465_v8 = vadd.s32 536870912, %v1464_v16  ;;  %vm1301_vm10 = vcmp.le.f32.partialorder %v1300_v53, 0.7853982 }
 0x228   :  { %v3819_v59 = vpop.eup %2425  ;;  %v1296_v17 = vxor.u32 2147483648, %v3816_v13  ;;  %v1387_v10 = vsel %vm1302_vm9, %v1386_v47, %v3731_v48  ;;  %v1460_v28 = vadd.s32 %v3805_v24, %v3799_v14  ;;  %v1667_v47 = vand.u32 3, %v3684_v50 }
 0x229   :  { %v1293_v38 = vxor.u32 2147483648, %v3819_v59  ;;  %v1379_v26 = vor.u32 4788187, %v1378_v32  ;;  %v1382_v9 = vcvt.s32.f32 %v1375_v52  ;;  %v3830_v30 = vshrl.u32 %v1465_v8, 30 }
 0x22a   :  { %v1297_v49 = vsel %vm1295_vm5, %v1296_v17, %v3819_v59  ;;  %v1389_v19 = vsel %vm1301_vm10, 0, %v1387_v10  ;;  %vm1392_vm14 = vweird.f32 %v3542_v23  ;;  %vm1669_vm15 = vcmp.eq.s32.totalorder %v1667_v47, 0 }
 0x22b   :  { %v1294_v15 = vsel %vm1292_vm4, %v3816_v13, %v1293_v38  ;;  %v1380_v43 = vand.u32 2147483647, %v1379_v26  ;;  %v1467_v11 = vshll.u32 %v3830_v30, 30  ;;  %v1393_v18 = vadd.s32 3, %v1389_v19 }
 0x22c   :  { %v1298_v36 = vsel %vm1291_vm7, %v1294_v15, %v1297_v49  ;;  %vm1672_vm1 = vcmp.eq.s32.totalorder %v1667_v47, 2  ;;  %vm1406_vm4 = vcmp.lt.s32.totalorder %v3612_v62, 0  ;;  %v1873_v50 = vand.u32 3, %v1389_v19 }
 0x22d   :  { %v3834_v33 = vsel %vm1288_vm8, nan, %v1298_v36  ;;  %v1383_v31 = vmul.f32 %v1382_v9, %v1380_v43  ;;  %v1468_v25 = vsub.s32 %v1464_v16, %v1467_v11  ;;  %v1394_v20 = vand.u32 3, %v1393_v18 }
 0x22e   :  { %vm3855_vm5 = vcmp.le.f32.partialorder %v1404_v51, 0.7853982  ;;  %vm1668_vm7 = vcmp.lt.s32.totalorder %v1667_v47, 2  ;;  %v1671_v18 = vsel %vm1669_vm15, %v3765_v63, %v1189_v6 }
 0x22f   :  { %v1384_v39 = vxor.u32 2147483648, %v1383_v31  ;;  %v1470_v56 = vsub.s32 0, %v1468_v25  ;;  %vm1399_vm11 = vcmp.eq.s32.totalorder %v1394_v20, 2  ;;  %vm1396_vm6 = vcmp.eq.s32.totalorder %v1394_v20, 0 }
 0x230   :  { %vm1395_vm12 = vcmp.lt.s32.totalorder %v1394_v20, 2 }
 0x231   :  { %v1385_v44 = vsel %vm1302_vm9, %v1384_v39, %v1383_v31  ;;  %v2179_v41 = vmin.u32 %v1470_v56, %v1468_v25  ;;  %v1770_v39 = vand.u32 3, %v3750_v61 }
 0x232   :  { %v1388_v7 = vsel %vm1301_vm10, %v3542_v23, %v1385_v44  ;;  %vm1875_vm10 = vcmp.eq.s32.totalorder %v1873_v50, 0 }
 0x233   :  { %2427 = vcosq.f32 %v1388_v7  ;;  %v1472_v29 = vclz %v2179_v41  ;;  %vm1772_vm2 = vcmp.eq.s32.totalorder %v1770_v39, 0  ;;  %vm1775_vm3 = vcmp.eq.s32.totalorder %v1770_v39, 2 }
 0x234   :  { %2429 = vsinq.f32 %v1388_v7  ;;  %v1490_v7 = vsub.s32 4, %v3830_v30  ;;  %vm1771_vm9 = vcmp.lt.s32.totalorder %v1770_v39, 2  ;;  %v1774_v19 = vsel %vm1772_vm2, %v3816_v13, %v1293_v38 }
 0x235   :  { %v2180_v12 = vadd.s32 4294967294, %v1472_v29  ;;  %v1674_v29 = vsel %vm1672_vm1, %v1192_v5, %v3774_v4  ;;  %v1777_v51 = vsel %vm1775_vm3, %v1296_v17, %v3819_v59  ;;  %vm1496_vm2 = vweird.f32 %v3612_v62 }
 0x236   :  { %v1491_v20 = vsel %vm1406_vm4, %v1490_v7, %v3830_v30  ;;  %v1675_v63 = vsel %vm1668_vm7, %v1671_v18, %v1674_v29  ;;  %v1778_v4 = vsel %vm1771_vm9, %v1774_v19, %v1777_v51 }
 0x237   :  { %vm2181_vm0 = vcmp.lt.s32.totalorder %v2180_v12, 0  ;;  %v1493_v5 = vsel %vm3855_vm5, 0, %v1491_v20  ;;  %v1676_v17 = vsel %vm1184_vm13, nan, %v1675_v63  ;;  %v1779_v30 = vsel %vm1288_vm8, nan, %v1778_v4 }
 0x238   :  { %v1475_v53 = vsel %vm2181_vm0, 0, %v2180_v12  ;;  %vm1878_vm0 = vcmp.eq.s32.totalorder %v1873_v50, 2  ;;  %v1497_v38 = vadd.s32 3, %v1493_v5 }
 0x239   :  { %v1476_v52 = vsub.s32 32, %v1475_v53  ;;  %v1477_v32 = vshll.u32 %v1468_v25, %v1475_v53  ;;  %v1480_v16 = vsub.s32 4294967266, %v1475_v53 }
 0x23a   :  { %v1498_v53 = vand.u32 3, %v1497_v38 }
 0x23b   :  { %v1478_v48 = vshrl.u32 %v1460_v28, %v1476_v52  ;;  %v1481_v26 = vadd.s32 127, %v1480_v16  ;;  %v1976_v52 = vand.u32 3, %v1493_v5  ;;  %v1987_v16 = vmul.f32 %v1779_v30, %v2885_v1 }
 0x23c   :  { %vm1500_vm15 = vcmp.eq.s32.totalorder %v1498_v53, 0  ;;  %vm1499_vm8 = vcmp.lt.s32.totalorder %v1498_v53, 2  ;;  %v1553_v5 = vstv %s3898_s25 }
 0x23d   :  { %v2428_v49 = vpop.eup %2427  ;;  %v1479_v36 = vor.u32 %v1478_v48, %v1477_v32  ;;  %v1482_v43 = vshll.u32 %v1481_v26, 23  ;;  %v1986_v32 = vmul.f32 %v1676_v17, %v2883_v0  ;;  %vm1978_vm13 = vcmp.eq.s32.totalorder %v1976_v52, 0 }
 0x23e   :  { %v2430_v9 = vpop.eup %2429  ;;  %v1400_v8 = vxor.u32 2147483648, %v2428_v49  ;;  %vm1977_vm1 = vcmp.lt.s32.totalorder %v1976_v52, 2 }
 0x23f   :  { %v1397_v15 = vxor.u32 2147483648, %v2430_v9  ;;  %v1483_v24 = vor.u32 4788187, %v1482_v43  ;;  %v1486_v11 = vcvt.s32.f32 %v1479_v36 }
 0x240   :  { %v1401_v31 = vsel %vm1399_vm11, %v1400_v8, %v2430_v9  ;;  %vm1874_vm11 = vcmp.lt.s32.totalorder %v1873_v50, 2  ;;  %v1880_v59 = vsel %vm1878_vm0, %v1400_v8, %v2430_v9 }
 0x241   :  { %v1398_v14 = vsel %vm1396_vm6, %v2428_v49, %v1397_v15  ;;  %v1484_v10 = vand.u32 2147483647, %v1483_v24  ;;  %v1877_v13 = vsel %vm1875_vm10, %v2428_v49, %v1397_v15  ;;  %vm1503_vm6 = vcmp.eq.s32.totalorder %v1498_v53, 2 }
 0x242   :  { %v1402_v25 = vsel %vm1395_vm12, %v1398_v14, %v1401_v31  ;;  %v1881_v28 = vsel %vm1874_vm11, %v1877_v13, %v1880_v59  ;;  %vm1981_vm12 = vcmp.eq.s32.totalorder %v1976_v52, 2  ;;  %v1990_v49 = vadd.f32 %v1987_v16, %v1986_v32 }
 0x243   :  { %v3849_v44 = vsel %vm1392_vm14, nan, %v1402_v25  ;;  %v1487_v56 = vmul.f32 %v1486_v11, %v1484_v10  ;;  %v1882_v48 = vsel %vm1392_vm14, nan, %v1881_v28  ;;  %v1509_v10 = vmul.f32 %v3810_v37, %v2883_v0 }
 0x244   :  { %v1988_v55 = vmul.f32 %v1882_v48, %v2887_v2  ;;  %v1511_v7 = vmul.f32 %v3849_v44, %v2887_v2  ;;  %v1534_v2 = vmul.f32 0.999, %v3991_v27  ;;  %v1535_v44 = vmul.f32 0.999, %v3994_v40 }
 0x245   :  { %v1488_v41 = vxor.u32 2147483648, %v1487_v56 }
 0x246   :  { %v1991_v14 = vadd.f32 %v1990_v49, %v1988_v55 }
 0x247   :  { %v1489_v12 = vsel %vm1406_vm4, %v1488_v41, %v1487_v56  ;;  %v1513_v56 = vstv %s1508_s23 }
 0x248   :  { %v1492_v6 = vsel %vm3855_vm5, %v3612_v62, %v1489_v12  ;;  %v1510_v62 = vmul.f32 %v3834_v33, %v2885_v1  ;;  %v1514_v61 = vmul.f32 %v1513_v56, %v1509_v10  ;;  %v1516_v18 = vmul.f32 %v1513_v56, %v1511_v7 }
 0x249   :  { %2431 = vcosq.f32 %v1492_v6  ;;  %v1532_v1 = vmul.f32 0.999, %v3323_v45  ;;  %v1533_v33 = vmul.f32 0.999, %v3986_v42  ;;  %v1548_v10 = vstv %s2182_s27 }
 0x24a   :  { %2433 = vsinq.f32 %v1492_v6  ;;  %v1515_v41 = vmul.f32 %v1513_v56, %v1510_v62  ;;  %v1536_v19 = vmul.f32 %v1514_v61, %v1514_v61  ;;  %v1538_v12 = vmul.f32 %v1516_v18, %v1516_v18 }
 0x24c   :  { %v1537_v51 = vmul.f32 %v1515_v41, %v1515_v41  ;;  %v1540_v37 = vmul.f32 0.001, %v1536_v19  ;;  %v1525_v49 = vmul.f32 0.1, %v1515_v41 }
 0x24e   :  { %v1541_v20 = vmul.f32 0.001, %v1537_v51  ;;  %v1544_v63 = vadd.f32 %v1540_v37, %v1532_v1 }
 0x250   :  { %v1545_v4 = vadd.f32 %v1541_v20, %v1533_v33  ;;  %v1554_v59 = vmul.f32 %v1553_v5, %v1544_v63 }
 0x252   :  { %v1555_v17 = vmul.f32 %v1553_v5, %v1545_v4  ;;  %v1558_v45 = vadd.f32 1e-16, %v1554_v59 }
 0x253   :  { %v2432_v26 = vpop.eup %2431 }
 0x254   :  { %v2434_v9 = vpop.eup %2433  ;;  %v1504_v22 = vxor.u32 2147483648, %v2432_v26  ;;  %v1559_v53 = vadd.f32 1e-16, %v1555_v17  ;;  %2435 = vrsqrt.f32 %v1558_v45 }
 0x255   :  { %v1501_v8 = vxor.u32 2147483648, %v2434_v9 }
 0x256   :  { %v1505_v15 = vsel %vm1503_vm6, %v1504_v22, %v2434_v9  ;;  %v1983_v23 = vsel %vm1981_vm12, %v1504_v22, %v2434_v9  ;;  %2437 = vrsqrt.f32 %v1559_v53  ;;  %v1526_v9 = vmul.f32 0.1, %v1516_v18 }
 0x257   :  { %v1502_v36 = vsel %vm1500_vm15, %v2432_v26, %v1501_v8  ;;  %v1980_v43 = vsel %vm1978_vm13, %v2432_v26, %v1501_v8  ;;  %v1524_v26 = vmul.f32 0.1, %v1514_v61  ;;  %v1520_v8 = vmul.f32 0.9, %v3354_v35 }
 0x258   :  { %v1506_v31 = vsel %vm1499_vm8, %v1502_v36, %v1505_v15  ;;  %v1984_v47 = vsel %vm1977_vm1, %v1980_v43, %v1983_v23  ;;  %v1521_v15 = vmul.f32 0.9, %v3375_v60  ;;  %v1522_v36 = vmul.f32 0.9, %v3992_v21 }
 0x259   :  { %v1507_v24 = vsel %vm1496_vm2, nan, %v1506_v31  ;;  %v1985_v11 = vsel %vm1496_vm2, nan, %v1984_v47  ;;  %v1523_v43 = vmul.f32 0.9, %v3995_v54 }
 0x25a   :  { %v1989_v39 = vmul.f32 %v1985_v11, %v2891_v3  ;;  %v1512_v50 = vmul.f32 %v1507_v24, %v2891_v3  ;;  %v1542_v3 = vmul.f32 0.001, %v1538_v12  ;;  %v1529_v24 = vadd.f32 %v1525_v49, %v1521_v15 }
 0x25c   :  { %v1992_v25 = vadd.f32 %v1991_v14, %v1989_v39  ;;  %v1517_v29 = vmul.f32 %v1513_v56, %v1512_v50  ;;  %v1546_v38 = vadd.f32 %v1542_v3, %v1534_v2  ;;  %v1528_v14 = vadd.f32 %v1524_v26, %v1520_v8 }
 0x25d   :  { %v1530_v39 = vadd.f32 %v1526_v9, %v1522_v36  ;;  %v1550_v7 = vmul.f32 %v1548_v10, %v1529_v24 }
 0x25e   :  { %1993 = vadd.xlane.f32.xlu0 %v1992_v25  ;;  %v1539_v0 = vmul.f32 %v1517_v29, %v1517_v29  ;;  %v1556_v30 = vmul.f32 %v1553_v5, %v1546_v38  ;;  %v1527_v22 = vmul.f32 0.1, %v1517_v29  ;;  %v2436_v23 = vpop.eup %2435  ;;  %v1549_v56 = vmul.f32 %v1548_v10, %v1528_v14 }
 0x25f   :  { %v1551_v35 = vmul.f32 %v1548_v10, %v1530_v39 }
 0x260   :  { %v1543_v6 = vmul.f32 0.001, %v1539_v0  ;;  %v1560_v52 = vadd.f32 1e-16, %v1556_v30  ;;  %v2438_v31 = vpop.eup %2437  ;;  %v1531_v25 = vadd.f32 %v1527_v22, %v1523_v43  ;;  %v1566_v60 = vmul.f32 %v2436_v23, %v1549_v56 }
 0x261   :  { %v1567_v61 = vmul.f32 %v2438_v31, %v1550_v7 }
 0x262   :  { %v1547_v13 = vadd.f32 %v1543_v6, %v1535_v44  ;;  %2439 = vrsqrt.f32 %v1560_v52  ;;  %v1552_v50 = vmul.f32 %v1548_v10, %v1531_v25  ;;  %v1570_v54 = vsub.f32 %v3987_v58, %v1566_v60 }
 0x263   :  { %v1571_v18 = vsub.f32 %v3990_v57, %v1567_v61 }
 0x264   :  { %v1557_v28 = vmul.f32 %v1553_v5, %v1547_v13  ;;  %2029 = vst [vmem:[#allocation16] sm:$0xff] %v1570_v54 }
 0x265   :  { %2030 = vst [vmem:[#allocation16 + $0x8] sm:$0xff] %v1571_v18 }
 0x266   :  { %v1561_v42 = vadd.f32 1e-16, %v1557_v28 }
 0x268   :  { %2441 = vrsqrt.f32 %v1561_v42 }
 0x26c   :  { %v2440_v11 = vpop.eup %2439 }
 0x26d   :  { %v1568_v41 = vmul.f32 %v2440_v11, %v1551_v35 }
 0x26f   :  { %v1572_v29 = vsub.f32 %v3993_v34, %v1568_v41 }
 0x271   :  { %2031 = vst [vmem:[#allocation16 + $0x10] sm:$0xff] %v1572_v29 }
 0x272   :  { %v2442_v62 = vpop.eup %2441 }
 0x273   :  { %v1569_v21 = vmul.f32 %v2442_v62, %v1552_v50 }
 0x275   :  { %v1573_v19 = vsub.f32 %v3996_v46, %v1569_v21 }
 0x277   :  { %2032 = vst [vmem:[#allocation16 + $0x18] sm:$0xff] %v1573_v19 }
 0x2eb   :  { %v1994_v32 = vpop.xlane.xlu0 %1993 }
 0x2ec   :  { %v1995_v27 = vrot.slane %v1994_v32, 4 }
 0x2ee   :  { %v1996_v40 = vadd.f32 %v1995_v27, %v1994_v32 }
 0x2f0   :  { %v1997_v16 = vrot.slane %v1996_v40, 2 }
 0x2f2   :  { %v1998_v48 = vadd.f32 %v1997_v16, %v1996_v40 }
 0x2f4   :  { %v1999_v55 = vrot.slane %v1998_v48, 1 }
 0x2f6   :  { %v2000_v47 = vadd.f32 %v1999_v55, %v1998_v48 }
 0x2f8   :  { %2237 = vpush %v2000_v47 }
 0x2f9   :  { %2568 = shalt.err (!%p2565_p5)
}
 0x2fa   :  { %s2569_s13 = scalar_lea.hbm %s3972_s7, 512 }
 0x2fb   :  { %p2570_p6 = scmp.ne.s32.totalorder %s3972_s7, %s2569_s13  ;;  %p2573_p7 = scmp.lt.u32.totalorder %s2569_s13, %s3972_s7 }
 0x2fd   :  { %p2575_p8 = pnand %p2573_p7, %p2570_p6 }
 0x2ff   :  { %2578 = shalt.err (!%p2575_p8)
}
 0x300   :  { %2048 = dma.vmem_to_hbm [thread:$0]  %s2043_s30, 512, %s3972_s7, [#allocation4], %s2745_s1, %s2745_s1, %s2746_s26  }
 0x301   :  { %s2002_s21 = smul.f32 3.0, %s3999_s29  ;;  %s2579_s1 = scalar_lea.hbm %s3974_s9, 16 }
 0x302   :  { %s2009_s4 = smul.f32 6.0, %s3999_s29  ;;  %p2580_p9 = scmp.ne.s32.totalorder %s3974_s9, %s2579_s1 }
 0x303   :  { %s2003_s22 = smul.f32 %s2002_s21, %s3999_s29  ;;  %p2583_p10 = scmp.lt.u32.totalorder %s2579_s1, %s3974_s9 }
 0x304   :  { %s2006_s24 = smul.f32 %s3999_s29, %s2889_s0 }
 0x305   :  { %s2017_s14 = smul.f32 0.999, %s3998_s20  ;;  %p2585_p11 = pnand %p2583_p10, %p2580_p9 }
 0x329   :  { %s2238_s18 = spop %2237 }
 0x32a   :  { %s2004_s28 = smul.f32 %s2238_s18, %s1508_s23 }
 0x32b   :  { %s2010_s27 = smul.f32 0.00048828125, %s2238_s18 }
 0x32c   :  { %s2005_s3 = ssub.f32 %s2003_s22, %s2004_s28 }
 0x32d   :  { %s2011_s10 = ssub.f32 %s2009_s4, %s2010_s27 }
 0x32e   :  { %s2007_s11 = ssub.f32 %s2005_s3, %s2006_s24 }
 0x32f   :  { %s2012_s12 = ssub.f32 %s2011_s10, %s2889_s0 }
 0x330   :  { %s2008_s13 = sadd.f32 %s2897_s6, %s2007_s11 }
 0x331   :  { %s2018_s16 = smul.f32 %s2012_s12, %s2012_s12 }
 0x332   :  { %2036 = sst [smem:[#allocation18]] %s2008_s13 }
 0x333   :  { %s2019_s17 = smul.f32 0.001, %s2018_s16 }
 0x335   :  { %s2020_s19 = sadd.f32 %s2019_s17, %s2017_s14 }
 0x336   :  { %2588 = shalt.err (!%p2585_p11)
}
 0x337   :  { %s2765_s0 = smov [#allocation18]   ;;  %s2022_s21 = smul.f32 %s3898_s25, %s2020_s19 }
 0x338   :  { %2064 = dma.smem_to_hbm %s2765_s0, 16, %s3974_s9, [#allocation19]  }
 0x339   :  { %s2023_s4 = sadd.f32 1e-16, %s2022_s21  ;;  %s2014_s22 = smul.f32 0.9, %s3997_s5 }
 0x33a   :  { %s2015_s18 = smul.f32 0.1, %s2012_s12  ;;  %s2200_s24 = sld [smem:[#allocation9 + $0x4]] }
 0x33b   :  { %v2024_v58 = vstv %s2023_s4  ;;  %s2589_s16 = scalar_lea.hbm %s3973_s8, 16 }
 0x33c   :  { %2443 = vrsqrt.f32 %v2024_v58  ;;  %s2016_s28 = sadd.f32 %s2015_s18, %s2014_s22  ;;  %p2590_p12 = scmp.ne.s32.totalorder %s3973_s8, %s2589_s16 }
 0x33d   :  { %p2593_p13 = scmp.lt.u32.totalorder %s2589_s16, %s3973_s8 }
 0x33f   :  { %p2595_p0 = pnand %p2593_p13, %p2590_p12 }
 0x340   :  { %s2021_s27 = smul.f32 %s2200_s24, %s2016_s28 }
 0x346   :  { %v2444_v57 = vpop.eup %2443 }
 0x347   :  { %2239 = vpush %v2444_v57 }
 0x378   :  { %s2240_s3 = spop %2239 }
 0x379   :  { %s2027_s10 = smul.f32 %s2240_s3, %s2021_s27 }
 0x37b   :  { %s2028_s11 = ssub.f32 %s3999_s29, %s2027_s10 }
 0x37d   :  { %2034 = sst [smem:[#allocation17]] %s2028_s11 }
 0x37e   :  { %2598 = shalt.err (!%p2595_p0)
}
 0x37f   :  { %s2766_s5 = smov [#allocation17]  }
 0x380   :  { %2056 = dma.smem_to_hbm %s2766_s5, 16, %s3973_s8, [#allocation6]  }
 0x381   :  { %2673 = dma.done.wait [#allocation4], 512  }
 0x382   :  { %2674 = vsyncadd [#allocation4], 4294966784 }
 0x383   :  { %2675 = dma.done.wait [#allocation6], 16  }
 0x384   :  { %2676 = vsyncadd [#allocation6], 4294967280 }
 0x385   :  { %2677 = dma.done.wait [#allocation19], 16  }
 0x386   :  { %2678 = vsyncadd [#allocation19], 4294967280 }
 0x387   :  { %2074 = sfence }
 0x388   :  { %2075 = vsyncpa [#allocation3], 1 }
 0x389   :  { %2076 = vsyncpa [#allocation14], 1 }
 0x38a   :  { %2077 = vsyncpa [#allocation4], 1 }
 0x38b   :  { %2078 = vsyncpa [#allocation5], 1 }
 0x38c   :  { %2079 = vsyncpa [#allocation6], 1 }
 0x38d   :  { %2080 = vsyncpa [#allocation19], 1 }
 0x38e   :  { %2081 = vsyncpa [#allocation7], 1 }
 0x38f   :  { %2082 = vsyncpa [#allocation10], 1 }

</bundles_post_ra>
